<compile_context>
chip_gen: v5e
topology: v5e:2x2
jax: 0.10.0
libtpu: 0.0.40
codegen_flags: <defaults>
</compile_context>

<pallas_src>
import functools

import jax
import jax.numpy as jnp
from jax.experimental import pallas as pl
from jax.experimental.pallas import tpu as pltpu


def _layernorm(x, gamma, beta, eps=1e-5):
    mu = jnp.mean(x, axis=-1, keepdims=True)
    var = jnp.mean((x - mu) ** 2, axis=-1, keepdims=True)
    return (x - mu) * jax.lax.rsqrt(var + eps) * gamma + beta


def _softmax_lastdim(x):
    x = x - jnp.max(x, axis=-1, keepdims=True)
    e = jnp.exp(x)
    return e * pl.reciprocal(jnp.sum(e, axis=-1, keepdims=True), approx=True)


# ----------------------------- fused forward kernel --------------------------

def _fused_forward_kernel(
    x_ref, emb_w_ref, emb_b_ref,
    wqkv_ref, bqkv_ref, wo_ref, w1_ref, b1_ref, w2_ref, ln_ref,
    fc_w_ref, fc_b_ref,
    o_ref,
    *, num_layers, num_heads,
):
    x = x_ref[0]                                   # (S, Din) — one batch element
    h = emb_w_ref.shape[1]
    hd = h // num_heads
    scale = 1.0 / float(hd) ** 0.5

    # Embedding: (S, Din) @ (Din, H) + b — weight already (in, out).
    xh = jnp.dot(x, emb_w_ref[...], preferred_element_type=jnp.float32) + emb_b_ref[...]

    # TODO(synk): for large num_layers switch this static unroll to
    # lax.fori_loop with dynamic ref indexing (wqkv_ref[l], ...).
    for l in range(num_layers):
        ln = ln_ref[l]                             # (6, H): bo, g1, be1, b2, g2, be2

        # Fused QKV projection: ONE (S, H) @ (H, 3H) MXU matmul + fused bias.
        qkv = (jnp.dot(xh, wqkv_ref[l], preferred_element_type=jnp.float32)
               + bqkv_ref[l])

        # Columns of wqkv are ordered [q_h0..q_h{nh-1} | k_h0.. | v_h0..];
        # stack per-head slices into a (nh, S, hd) batch for batched einsums.
        def stack_heads(base):
            return jnp.stack(
                [qkv[:, (base * num_heads + i) * hd:(base * num_heads + i + 1) * hd]
                 for i in range(num_heads)],
                axis=0)

        qh = stack_heads(0)
        kh = stack_heads(1)
        vh = stack_heads(2)

        # Batched (over heads) scaled dot-product attention.
        sc = jnp.einsum("hqd,hkd->hqk", qh, kh,
                        preferred_element_type=jnp.float32) * scale
        p = _softmax_lastdim(sc)
        attn_h = jnp.einsum("hqk,hkd->hqd", p, vh,
                            preferred_element_type=jnp.float32)     # (nh, S, hd)

        # Merge heads with one lane-dense concat, then a single dense
        # (S, H) @ (H, H) output projection (no masked per-head stores).
        attn_cat = jnp.concatenate([attn_h[i] for i in range(num_heads)], axis=-1)
        attn_out = (jnp.dot(attn_cat, wo_ref[l],
                            preferred_element_type=jnp.float32) + ln[0:1, :])

        # Post-norm residual block 1 (self-attention).
        y = _layernorm(xh + attn_out, ln[1:2, :], ln[2:3, :])

        # FFN: linear -> ReLU -> linear, post-norm residual block 2.
        ff = jnp.dot(y, w1_ref[l], preferred_element_type=jnp.float32) + b1_ref[l]
        ff = jnp.maximum(ff, 0.0)
        ff = jnp.dot(ff, w2_ref[l], preferred_element_type=jnp.float32) + ln[3:4, :]
        xh = _layernorm(y + ff, ln[4:5, :], ln[5:6, :])

    # Head: mean over seq (PyTorch dim=0), fc, softmax.
    xm = jnp.mean(xh, axis=0, keepdims=True)                        # (1, H)
    logits = (jnp.dot(xm, fc_w_ref[...], preferred_element_type=jnp.float32)
              + fc_b_ref[...])
    o_ref[0] = _softmax_lastdim(logits)                             # (1, O)


# --------------------------------- wrapper -----------------------------------

def gameplay_transformer_forward(params, x_sbd, num_heads):
    """x_sbd: (S, B, input_size), PyTorch seq-first convention. Returns (B, O)."""
    s, b, din = x_sbd.shape
    h = params["emb_w"].shape[1]
    o = params["fc_w"].shape[1]
    num_layers = params["wqkv"].shape[0]
    ff = params["w1"].shape[2]
    hd = h // num_heads
    L = num_layers

    x_bsd = jnp.transpose(x_sbd, (1, 0, 2))                         # (B, S, Din)

    # Advisory cost estimate so XLA does not treat the fused call as zero-cost.
    per_layer_flops = (2 * s * h * 3 * h                 # fused QKV
                       + 2 * num_heads * s * s * hd * 2  # scores + AV
                       + 2 * s * h * h                   # output projection
                       + 4 * s * h * ff)                 # FFN
    flops = b * (2 * s * din * h + L * per_layer_flops + 2 * h * o)
    transcendentals = b * (L * num_heads * s * s + o)
    param_bytes = sum(int(v.size) * 4 for v in params.values())
    bytes_accessed = int(x_bsd.size) * 4 + b * o * 4 + param_bytes
    cost = pl.CostEstimate(flops=int(flops),
                           transcendentals=int(transcendentals),
                           bytes_accessed=int(bytes_accessed))

    kernel = functools.partial(_fused_forward_kernel,
                               num_layers=num_layers, num_heads=num_heads)

    out3 = pl.pallas_call(
        kernel,
        out_shape=jax.ShapeDtypeStruct((b, 1, o), jnp.float32),
        grid=(b,),
        in_specs=[
            pl.BlockSpec((1, s, din), lambda i: (i, 0, 0)),         # x (per batch elem)
            pl.BlockSpec((din, h), lambda i: (0, 0)),               # emb weight (in,out)
            pl.BlockSpec((1, h), lambda i: (0, 0)),                 # emb bias
            pl.BlockSpec((L, h, 3 * h), lambda i: (0, 0, 0)),       # fused QKV weights
            pl.BlockSpec((L, 1, 3 * h), lambda i: (0, 0, 0)),       # fused QKV biases
            pl.BlockSpec((L, h, h), lambda i: (0, 0, 0)),           # out-proj weights
            pl.BlockSpec((L, h, ff), lambda i: (0, 0, 0)),          # FFN w1
            pl.BlockSpec((L, 1, ff), lambda i: (0, 0, 0)),          # FFN b1
            pl.BlockSpec((L, ff, h), lambda i: (0, 0, 0)),          # FFN w2
            pl.BlockSpec((L, 6, h), lambda i: (0, 0, 0)),           # packed bo/g1/be1/b2/g2/be2
            pl.BlockSpec((h, o), lambda i: (0, 0)),                 # fc weight (in,out)
            pl.BlockSpec((1, o), lambda i: (0, 0)),                 # fc bias
        ],
        out_specs=pl.BlockSpec((1, 1, o), lambda i: (i, 0, 0)),
        compiler_params=pltpu.CompilerParams(
            # Batch axis is parallel -> both v7x TensorCores get work.
            dimension_semantics=("parallel",),
            # TODO(synk): at large H raise vmem_limit_bytes (v5e/v6e) and
            # FF-block or bf16-cast resident weights to fit v7x's 64 MiB VMEM.
        ),
        cost_estimate=cost,
    )(
        x_bsd,
        params["emb_w"], params["emb_b"],
        params["wqkv"], params["bqkv"], params["wo"],
        params["w1"], params["b1"], params["w2"], params["ln"],
        params["fc_w"], params["fc_b"],
    )
    return out3.reshape(b, o)


# ------------------------------- parameters ----------------------------------

def init_params(key, input_size, num_heads, hidden_size, num_layers, output_size):
    """Random params in the kernel's packed, pre-transposed layout.

    PyTorch-style weights (out, in) are generated first, then converted:
      * every matmul weight transposed to (in, out),
      * wq/wk/wv and bq/bk/bv fused along the output dim,
      * bo, gamma1, beta1, b2, gamma2, beta2 packed into a (6, H) block,
      * per-layer tensors stacked on a leading (num_layers, ...) axis.
    """
    h, ff = hidden_size, hidden_size * 4
    keys = jax.random.split(key, 4 + num_layers)
    scale = 0.05

    def rnd(k, shape):
        return (scale * jax.random.normal(k, shape)).astype(jnp.float32)

    wqkv_l, bqkv_l, wo_l, w1_l, b1_l, w2_l, ln_l = [], [], [], [], [], [], []
    for l in range(num_layers):
        lk = jax.random.split(keys[4 + l], 12)
        wq, wk, wv = rnd(lk[0], (h, h)), rnd(lk[1], (h, h)), rnd(lk[2], (h, h))
        bq, bk, bv = rnd(lk[3], (h,)), rnd(lk[4], (h,)), rnd(lk[5], (h,))
        wo, bo = rnd(lk[6], (h, h)), rnd(lk[7], (h,))
        w1, b1 = rnd(lk[8], (ff, h)), rnd(lk[9], (ff,))
        w2, b2 = rnd(lk[10], (h, ff)), rnd(lk[11], (h,))
        ones = jnp.ones((h,), jnp.float32)
        zeros = jnp.zeros((h,), jnp.float32)

        wqkv_l.append(jnp.concatenate([wq.T, wk.T, wv.T], axis=1))      # (H, 3H)
        bqkv_l.append(jnp.concatenate([bq, bk, bv])[None, :])           # (1, 3H)
        wo_l.append(wo.T)                                               # (H, H)
        w1_l.append(w1.T)                                               # (H, FF)
        b1_l.append(b1[None, :])                                        # (1, FF)
        w2_l.append(w2.T)                                               # (FF, H)
        ln_l.append(jnp.stack([bo, ones, zeros, b2, ones, zeros], 0))   # (6, H)

    return {
        "emb_w": rnd(keys[0], (h, input_size)).T,           # (Din, H)
        "emb_b": rnd(keys[1], (h,))[None, :],               # (1, H)
        "fc_w": rnd(keys[2], (output_size, h)).T,           # (H, O)
        "fc_b": rnd(keys[3], (output_size,))[None, :],      # (1, O)
        "wqkv": jnp.stack(wqkv_l),
        "bqkv": jnp.stack(bqkv_l),
        "wo": jnp.stack(wo_l),
        "w1": jnp.stack(w1_l),
        "b1": jnp.stack(b1_l),
        "w2": jnp.stack(w2_l),
        "ln": jnp.stack(ln_l),
    }


# ----------------------------------- main -------------------------------------

if __name__ == "__main__":
    input_size, num_heads, hidden_size, num_layers, output_size = 16, 4, 32, 2, 8
    seq, batch = 8, 2

    key = jax.random.PRNGKey(0)
    pkey, xkey = jax.random.split(key)
    params = init_params(pkey, input_size, num_heads, hidden_size,
                         num_layers, output_size)
    x = jax.random.normal(xkey, (seq, batch, input_size), dtype=jnp.float32)

    out = gameplay_transformer_forward(params, x, num_heads)
    out = jax.block_until_ready(out)
    assert out.shape == (batch, output_size)
    assert bool(jnp.all(jnp.isfinite(out)))
    print("KERNEL_OK")
</pallas_src>

<mosaic_0001>
module attributes {stable_mosaic.version = 11 : i64} {
  func.func @_fused_forward_kernel(%arg0: i32, %arg1: memref<1x8x16xf32, #tpu.memory_space<vmem>>, %arg2: memref<16x32xf32, #tpu.memory_space<vmem>>, %arg3: memref<1x32xf32, #tpu.memory_space<vmem>>, %arg4: memref<2x32x96xf32, #tpu.memory_space<vmem>>, %arg5: memref<2x1x96xf32, #tpu.memory_space<vmem>>, %arg6: memref<2x32x32xf32, #tpu.memory_space<vmem>>, %arg7: memref<2x32x128xf32, #tpu.memory_space<vmem>>, %arg8: memref<2x1x128xf32, #tpu.memory_space<vmem>>, %arg9: memref<2x128x32xf32, #tpu.memory_space<vmem>>, %arg10: memref<2x6x32xf32, #tpu.memory_space<vmem>>, %arg11: memref<32x8xf32, #tpu.memory_space<vmem>>, %arg12: memref<1x8xf32, #tpu.memory_space<vmem>>, %arg13: memref<1x1x8xf32, #tpu.memory_space<vmem>>) attributes {dimension_semantics = [#tpu.dimension_semantics<parallel>], iteration_bounds = array<i64: 2>, scalar_prefetch = 0 : i64, scratch_operands = 0 : i64, tpu.core_type = #tpu.core_type<tc>, window_params = [{transform_indices = @transform_0, window_bounds = array<i64: 1, 8, 16>}, {pipeline_mode = #tpu.pipeline_mode<synchronous>, transform_indices = @transform_1, window_bounds = array<i64: 16, 32>}, {pipeline_mode = #tpu.pipeline_mode<synchronous>, transform_indices = @transform_2, window_bounds = array<i64: 1, 32>}, {pipeline_mode = #tpu.pipeline_mode<synchronous>, transform_indices = @transform_3, window_bounds = array<i64: 2, 32, 96>}, {pipeline_mode = #tpu.pipeline_mode<synchronous>, transform_indices = @transform_4, window_bounds = array<i64: 2, 1, 96>}, {pipeline_mode = #tpu.pipeline_mode<synchronous>, transform_indices = @transform_5, window_bounds = array<i64: 2, 32, 32>}, {pipeline_mode = #tpu.pipeline_mode<synchronous>, transform_indices = @transform_6, window_bounds = array<i64: 2, 32, 128>}, {pipeline_mode = #tpu.pipeline_mode<synchronous>, transform_indices = @transform_7, window_bounds = array<i64: 2, 1, 128>}, {pipeline_mode = #tpu.pipeline_mode<synchronous>, transform_indices = @transform_8, window_bounds = array<i64: 2, 128, 32>}, {pipeline_mode = #tpu.pipeline_mode<synchronous>, transform_indices = @transform_9, window_bounds = array<i64: 2, 6, 32>}, {pipeline_mode = #tpu.pipeline_mode<synchronous>, transform_indices = @transform_10, window_bounds = array<i64: 32, 8>}, {pipeline_mode = #tpu.pipeline_mode<synchronous>, transform_indices = @transform_11, window_bounds = array<i64: 1, 8>}, {transform_indices = @transform_12, window_bounds = array<i64: 1, 1, 8>}]} {
    %c0 = arith.constant 0 : index
    %c0_0 = arith.constant 0 : index
    %c0_1 = arith.constant 0 : index
    %0 = vector.load %arg1[%c0, %c0_0, %c0_1] : memref<1x8x16xf32, #tpu.memory_space<vmem>>, vector<1x8x16xf32>
    %1 = vector.shape_cast %0 : vector<1x8x16xf32> to vector<8x16xf32>
    %c0_2 = arith.constant 0 : index
    %c0_3 = arith.constant 0 : index
    %2 = vector.load %arg2[%c0_2, %c0_3] : memref<16x32xf32, #tpu.memory_space<vmem>>, vector<16x32xf32>
    %cst = arith.constant dense<0.000000e+00> : vector<8x32xf32>
    %3 = tpu.matmul %1, %2, %cst {dimension_numbers = #tpu.dot_dimension_numbers<[1], [0], [0], [1], [0, 0, 1, 1], [], []>} : vector<8x16xf32>, vector<16x32xf32>, vector<8x32xf32> -> vector<8x32xf32>
    %c0_4 = arith.constant 0 : index
    %c0_5 = arith.constant 0 : index
    %4 = vector.load %arg3[%c0_4, %c0_5] : memref<1x32xf32, #tpu.memory_space<vmem>>, vector<1x32xf32>
    %5 = vector.broadcast %4 : vector<1x32xf32> to vector<8x32xf32>
    %6 = arith.addf %3, %5 : vector<8x32xf32>
    %c0_6 = arith.constant 0 : index
    %c0_7 = arith.constant 0 : index
    %c0_8 = arith.constant 0 : index
    %7 = vector.load %arg10[%c0_6, %c0_7, %c0_8] : memref<2x6x32xf32, #tpu.memory_space<vmem>>, vector<1x6x32xf32>
    %8 = vector.shape_cast %7 : vector<1x6x32xf32> to vector<6x32xf32>
    %c0_9 = arith.constant 0 : index
    %c0_10 = arith.constant 0 : index
    %c0_11 = arith.constant 0 : index
    %9 = vector.load %arg4[%c0_9, %c0_10, %c0_11] : memref<2x32x96xf32, #tpu.memory_space<vmem>>, vector<1x32x96xf32>
    %10 = vector.shape_cast %9 : vector<1x32x96xf32> to vector<32x96xf32>
    %cst_12 = arith.constant dense<0.000000e+00> : vector<8x96xf32>
    %11 = tpu.matmul %6, %10, %cst_12 {dimension_numbers = #tpu.dot_dimension_numbers<[1], [0], [0], [1], [0, 0, 1, 1], [], []>} : vector<8x32xf32>, vector<32x96xf32>, vector<8x96xf32> -> vector<8x96xf32>
    %c0_13 = arith.constant 0 : index
    %c0_14 = arith.constant 0 : index
    %c0_15 = arith.constant 0 : index
    %12 = vector.load %arg5[%c0_13, %c0_14, %c0_15] : memref<2x1x96xf32, #tpu.memory_space<vmem>>, vector<1x1x96xf32>
    %13 = vector.shape_cast %12 : vector<1x1x96xf32> to vector<1x96xf32>
    %14 = vector.broadcast %13 : vector<1x96xf32> to vector<8x96xf32>
    %15 = arith.addf %11, %14 : vector<8x96xf32>
    %16 = vector.extract_strided_slice %15 {offsets = [0, 0], sizes = [8, 8], strides = [1, 1]} : vector<8x96xf32> to vector<8x8xf32>
    %17 = vector.extract_strided_slice %15 {offsets = [0, 8], sizes = [8, 8], strides = [1, 1]} : vector<8x96xf32> to vector<8x8xf32>
    %18 = vector.extract_strided_slice %15 {offsets = [0, 16], sizes = [8, 8], strides = [1, 1]} : vector<8x96xf32> to vector<8x8xf32>
    %19 = vector.extract_strided_slice %15 {offsets = [0, 24], sizes = [8, 8], strides = [1, 1]} : vector<8x96xf32> to vector<8x8xf32>
    %20 = vector.shape_cast %16 : vector<8x8xf32> to vector<1x8x8xf32>
    %21 = vector.shape_cast %17 : vector<8x8xf32> to vector<1x8x8xf32>
    %22 = vector.shape_cast %18 : vector<8x8xf32> to vector<1x8x8xf32>
    %23 = vector.shape_cast %19 : vector<8x8xf32> to vector<1x8x8xf32>
    %24 = tpu.concatenate %20, %21, %22, %23 in 0 : vector<1x8x8xf32>, vector<1x8x8xf32>, vector<1x8x8xf32>, vector<1x8x8xf32> -> vector<4x8x8xf32>
    %25 = vector.extract_strided_slice %15 {offsets = [0, 32], sizes = [8, 8], strides = [1, 1]} : vector<8x96xf32> to vector<8x8xf32>
    %26 = vector.extract_strided_slice %15 {offsets = [0, 40], sizes = [8, 8], strides = [1, 1]} : vector<8x96xf32> to vector<8x8xf32>
    %27 = vector.extract_strided_slice %15 {offsets = [0, 48], sizes = [8, 8], strides = [1, 1]} : vector<8x96xf32> to vector<8x8xf32>
    %28 = vector.extract_strided_slice %15 {offsets = [0, 56], sizes = [8, 8], strides = [1, 1]} : vector<8x96xf32> to vector<8x8xf32>
    %29 = vector.shape_cast %25 : vector<8x8xf32> to vector<1x8x8xf32>
    %30 = vector.shape_cast %26 : vector<8x8xf32> to vector<1x8x8xf32>
    %31 = vector.shape_cast %27 : vector<8x8xf32> to vector<1x8x8xf32>
    %32 = vector.shape_cast %28 : vector<8x8xf32> to vector<1x8x8xf32>
    %33 = tpu.concatenate %29, %30, %31, %32 in 0 : vector<1x8x8xf32>, vector<1x8x8xf32>, vector<1x8x8xf32>, vector<1x8x8xf32> -> vector<4x8x8xf32>
    %34 = vector.extract_strided_slice %15 {offsets = [0, 64], sizes = [8, 8], strides = [1, 1]} : vector<8x96xf32> to vector<8x8xf32>
    %35 = vector.extract_strided_slice %15 {offsets = [0, 72], sizes = [8, 8], strides = [1, 1]} : vector<8x96xf32> to vector<8x8xf32>
    %36 = vector.extract_strided_slice %15 {offsets = [0, 80], sizes = [8, 8], strides = [1, 1]} : vector<8x96xf32> to vector<8x8xf32>
    %37 = vector.extract_strided_slice %15 {offsets = [0, 88], sizes = [8, 8], strides = [1, 1]} : vector<8x96xf32> to vector<8x8xf32>
    %38 = vector.shape_cast %34 : vector<8x8xf32> to vector<1x8x8xf32>
    %39 = vector.shape_cast %35 : vector<8x8xf32> to vector<1x8x8xf32>
    %40 = vector.shape_cast %36 : vector<8x8xf32> to vector<1x8x8xf32>
    %41 = vector.shape_cast %37 : vector<8x8xf32> to vector<1x8x8xf32>
    %42 = tpu.concatenate %38, %39, %40, %41 in 0 : vector<1x8x8xf32>, vector<1x8x8xf32>, vector<1x8x8xf32>, vector<1x8x8xf32> -> vector<4x8x8xf32>
    "tpu.trace_start"() <{level = 10 : i32, message = "hqd,hkd->hqk"}> : () -> ()
    %cst_16 = arith.constant dense<0.000000e+00> : vector<4x8x8xf32>
    %43 = tpu.matmul %24, %33, %cst_16 {dimension_numbers = #tpu.dot_dimension_numbers<[2], [2], [1], [1], [0, 0, 0, 1, 1, 1], [0], [0]>} : vector<4x8x8xf32>, vector<4x8x8xf32>, vector<4x8x8xf32> -> vector<4x8x8xf32>
    "tpu.trace_stop"() : () -> ()
    %cst_17 = arith.constant 0.353553385 : f32
    %44 = vector.broadcast %cst_17 : f32 to vector<4x8x8xf32>
    %45 = arith.mulf %43, %44 : vector<4x8x8xf32>
    %cst_18 = arith.constant dense<0xFF800000> : vector<4x8xf32>
    %46 = vector.multi_reduction <maximumf>, %45, %cst_18 [2] : vector<4x8x8xf32> to vector<4x8xf32>
    %47 = vector.shape_cast %46 : vector<4x8xf32> to vector<4x8x1xf32>
    %48 = vector.broadcast %47 : vector<4x8x1xf32> to vector<4x8x8xf32>
    %49 = arith.subf %45, %48 : vector<4x8x8xf32>
    %50 = math.exp %49 : vector<4x8x8xf32>
    %cst_19 = arith.constant dense<0.000000e+00> : vector<4x8xf32>
    %51 = vector.multi_reduction <add>, %50, %cst_19 [2] : vector<4x8x8xf32> to vector<4x8xf32>
    %52 = vector.shape_cast %51 : vector<4x8xf32> to vector<4x8x1xf32>
    %53 = tpu.reciprocal %52 {approx = true} : vector<4x8x1xf32> -> vector<4x8x1xf32>
    %54 = vector.broadcast %53 : vector<4x8x1xf32> to vector<4x8x8xf32>
    %55 = arith.mulf %50, %54 : vector<4x8x8xf32>
    "tpu.trace_start"() <{level = 10 : i32, message = "hqk,hkd->hqd"}> : () -> ()
    %cst_20 = arith.constant dense<0.000000e+00> : vector<4x8x8xf32>
    %56 = tpu.matmul %55, %42, %cst_20 {dimension_numbers = #tpu.dot_dimension_numbers<[2], [1], [1], [2], [0, 0, 0, 1, 1, 2], [0], [0]>} : vector<4x8x8xf32>, vector<4x8x8xf32>, vector<4x8x8xf32> -> vector<4x8x8xf32>
    "tpu.trace_stop"() : () -> ()
    %57 = vector.extract_strided_slice %56 {offsets = [0, 0, 0], sizes = [1, 8, 8], strides = [1, 1, 1]} : vector<4x8x8xf32> to vector<1x8x8xf32>
    %58 = vector.shape_cast %57 : vector<1x8x8xf32> to vector<8x8xf32>
    %59 = vector.extract_strided_slice %56 {offsets = [1, 0, 0], sizes = [1, 8, 8], strides = [1, 1, 1]} : vector<4x8x8xf32> to vector<1x8x8xf32>
    %60 = vector.shape_cast %59 : vector<1x8x8xf32> to vector<8x8xf32>
    %61 = vector.extract_strided_slice %56 {offsets = [2, 0, 0], sizes = [1, 8, 8], strides = [1, 1, 1]} : vector<4x8x8xf32> to vector<1x8x8xf32>
    %62 = vector.shape_cast %61 : vector<1x8x8xf32> to vector<8x8xf32>
    %63 = vector.extract_strided_slice %56 {offsets = [3, 0, 0], sizes = [1, 8, 8], strides = [1, 1, 1]} : vector<4x8x8xf32> to vector<1x8x8xf32>
    %64 = vector.shape_cast %63 : vector<1x8x8xf32> to vector<8x8xf32>
    %65 = tpu.concatenate %58, %60, %62, %64 in 1 : vector<8x8xf32>, vector<8x8xf32>, vector<8x8xf32>, vector<8x8xf32> -> vector<8x32xf32>
    %c0_21 = arith.constant 0 : index
    %c0_22 = arith.constant 0 : index
    %c0_23 = arith.constant 0 : index
    %66 = vector.load %arg6[%c0_21, %c0_22, %c0_23] : memref<2x32x32xf32, #tpu.memory_space<vmem>>, vector<1x32x32xf32>
    %67 = vector.shape_cast %66 : vector<1x32x32xf32> to vector<32x32xf32>
    %cst_24 = arith.constant dense<0.000000e+00> : vector<8x32xf32>
    %68 = tpu.matmul %65, %67, %cst_24 {dimension_numbers = #tpu.dot_dimension_numbers<[1], [0], [0], [1], [0, 0, 1, 1], [], []>} : vector<8x32xf32>, vector<32x32xf32>, vector<8x32xf32> -> vector<8x32xf32>
    %69 = vector.extract_strided_slice %8 {offsets = [0, 0], sizes = [1, 32], strides = [1, 1]} : vector<6x32xf32> to vector<1x32xf32>
    %70 = vector.broadcast %69 : vector<1x32xf32> to vector<8x32xf32>
    %71 = arith.addf %68, %70 : vector<8x32xf32>
    %72 = arith.addf %6, %71 : vector<8x32xf32>
    %73 = vector.extract_strided_slice %8 {offsets = [1, 0], sizes = [1, 32], strides = [1, 1]} : vector<6x32xf32> to vector<1x32xf32>
    %74 = vector.extract_strided_slice %8 {offsets = [2, 0], sizes = [1, 32], strides = [1, 1]} : vector<6x32xf32> to vector<1x32xf32>
    %cst_25 = arith.constant dense<0.000000e+00> : vector<8xf32>
    %75 = vector.multi_reduction <add>, %72, %cst_25 [1] : vector<8x32xf32> to vector<8xf32>
    %76 = vector.shape_cast %75 : vector<8xf32> to vector<8x1xf32>
    %cst_26 = arith.constant 3.200000e+01 : f32
    %77 = vector.broadcast %cst_26 : f32 to vector<8x1xf32>
    %78 = arith.divf %76, %77 : vector<8x1xf32>
    %79 = vector.broadcast %78 : vector<8x1xf32> to vector<8x32xf32>
    %80 = arith.subf %72, %79 : vector<8x32xf32>
    %81 = arith.mulf %80, %80 : vector<8x32xf32>
    %cst_27 = arith.constant dense<0.000000e+00> : vector<8xf32>
    %82 = vector.multi_reduction <add>, %81, %cst_27 [1] : vector<8x32xf32> to vector<8xf32>
    %83 = vector.shape_cast %82 : vector<8xf32> to vector<8x1xf32>
    %cst_28 = arith.constant 3.200000e+01 : f32
    %84 = vector.broadcast %cst_28 : f32 to vector<8x1xf32>
    %85 = arith.divf %83, %84 : vector<8x1xf32>
    %86 = vector.broadcast %78 : vector<8x1xf32> to vector<8x32xf32>
    %87 = arith.subf %72, %86 : vector<8x32xf32>
    %cst_29 = arith.constant 9.99999974E-6 : f32
    %88 = vector.broadcast %cst_29 : f32 to vector<8x1xf32>
    %89 = arith.addf %85, %88 : vector<8x1xf32>
    %90 = math.rsqrt %89 : vector<8x1xf32>
    %91 = vector.broadcast %90 : vector<8x1xf32> to vector<8x32xf32>
    %92 = arith.mulf %87, %91 : vector<8x32xf32>
    %93 = vector.broadcast %73 : vector<1x32xf32> to vector<8x32xf32>
    %94 = arith.mulf %92, %93 : vector<8x32xf32>
    %95 = vector.broadcast %74 : vector<1x32xf32> to vector<8x32xf32>
    %96 = arith.addf %94, %95 : vector<8x32xf32>
    %c0_30 = arith.constant 0 : index
    %c0_31 = arith.constant 0 : index
    %c0_32 = arith.constant 0 : index
    %97 = vector.load %arg7[%c0_30, %c0_31, %c0_32] : memref<2x32x128xf32, #tpu.memory_space<vmem>>, vector<1x32x128xf32>
    %98 = vector.shape_cast %97 : vector<1x32x128xf32> to vector<32x128xf32>
    %cst_33 = arith.constant dense<0.000000e+00> : vector<8x128xf32>
    %99 = tpu.matmul %96, %98, %cst_33 {dimension_numbers = #tpu.dot_dimension_numbers<[1], [0], [0], [1], [0, 0, 1, 1], [], []>} : vector<8x32xf32>, vector<32x128xf32>, vector<8x128xf32> -> vector<8x128xf32>
    %c0_34 = arith.constant 0 : index
    %c0_35 = arith.constant 0 : index
    %c0_36 = arith.constant 0 : index
    %100 = vector.load %arg8[%c0_34, %c0_35, %c0_36] : memref<2x1x128xf32, #tpu.memory_space<vmem>>, vector<1x1x128xf32>
    %101 = vector.shape_cast %100 : vector<1x1x128xf32> to vector<1x128xf32>
    %102 = vector.broadcast %101 : vector<1x128xf32> to vector<8x128xf32>
    %103 = arith.addf %99, %102 : vector<8x128xf32>
    %cst_37 = arith.constant 0.000000e+00 : f32
    %104 = vector.broadcast %cst_37 : f32 to vector<8x128xf32>
    %105 = arith.maximumf %103, %104 : vector<8x128xf32>
    %c0_38 = arith.constant 0 : index
    %c0_39 = arith.constant 0 : index
    %c0_40 = arith.constant 0 : index
    %106 = vector.load %arg9[%c0_38, %c0_39, %c0_40] : memref<2x128x32xf32, #tpu.memory_space<vmem>>, vector<1x128x32xf32>
    %107 = vector.shape_cast %106 : vector<1x128x32xf32> to vector<128x32xf32>
    %cst_41 = arith.constant dense<0.000000e+00> : vector<8x32xf32>
    %108 = tpu.matmul %105, %107, %cst_41 {dimension_numbers = #tpu.dot_dimension_numbers<[1], [0], [0], [1], [0, 0, 1, 1], [], []>} : vector<8x128xf32>, vector<128x32xf32>, vector<8x32xf32> -> vector<8x32xf32>
    %109 = vector.extract_strided_slice %8 {offsets = [3, 0], sizes = [1, 32], strides = [1, 1]} : vector<6x32xf32> to vector<1x32xf32>
    %110 = vector.broadcast %109 : vector<1x32xf32> to vector<8x32xf32>
    %111 = arith.addf %108, %110 : vector<8x32xf32>
    %112 = arith.addf %96, %111 : vector<8x32xf32>
    %113 = vector.extract_strided_slice %8 {offsets = [4, 0], sizes = [1, 32], strides = [1, 1]} : vector<6x32xf32> to vector<1x32xf32>
    %114 = vector.extract_strided_slice %8 {offsets = [5, 0], sizes = [1, 32], strides = [1, 1]} : vector<6x32xf32> to vector<1x32xf32>
    %cst_42 = arith.constant dense<0.000000e+00> : vector<8xf32>
    %115 = vector.multi_reduction <add>, %112, %cst_42 [1] : vector<8x32xf32> to vector<8xf32>
    %116 = vector.shape_cast %115 : vector<8xf32> to vector<8x1xf32>
    %cst_43 = arith.constant 3.200000e+01 : f32
    %117 = vector.broadcast %cst_43 : f32 to vector<8x1xf32>
    %118 = arith.divf %116, %117 : vector<8x1xf32>
    %119 = vector.broadcast %118 : vector<8x1xf32> to vector<8x32xf32>
    %120 = arith.subf %112, %119 : vector<8x32xf32>
    %121 = arith.mulf %120, %120 : vector<8x32xf32>
    %cst_44 = arith.constant dense<0.000000e+00> : vector<8xf32>
    %122 = vector.multi_reduction <add>, %121, %cst_44 [1] : vector<8x32xf32> to vector<8xf32>
    %123 = vector.shape_cast %122 : vector<8xf32> to vector<8x1xf32>
    %cst_45 = arith.constant 3.200000e+01 : f32
    %124 = vector.broadcast %cst_45 : f32 to vector<8x1xf32>
    %125 = arith.divf %123, %124 : vector<8x1xf32>
    %126 = vector.broadcast %118 : vector<8x1xf32> to vector<8x32xf32>
    %127 = arith.subf %112, %126 : vector<8x32xf32>
    %cst_46 = arith.constant 9.99999974E-6 : f32
    %128 = vector.broadcast %cst_46 : f32 to vector<8x1xf32>
    %129 = arith.addf %125, %128 : vector<8x1xf32>
    %130 = math.rsqrt %129 : vector<8x1xf32>
    %131 = vector.broadcast %130 : vector<8x1xf32> to vector<8x32xf32>
    %132 = arith.mulf %127, %131 : vector<8x32xf32>
    %133 = vector.broadcast %113 : vector<1x32xf32> to vector<8x32xf32>
    %134 = arith.mulf %132, %133 : vector<8x32xf32>
    %135 = vector.broadcast %114 : vector<1x32xf32> to vector<8x32xf32>
    %136 = arith.addf %134, %135 : vector<8x32xf32>
    %c1 = arith.constant 1 : index
    %c0_47 = arith.constant 0 : index
    %c0_48 = arith.constant 0 : index
    %137 = vector.load %arg10[%c1, %c0_47, %c0_48] : memref<2x6x32xf32, #tpu.memory_space<vmem>>, vector<1x6x32xf32>
    %138 = vector.shape_cast %137 : vector<1x6x32xf32> to vector<6x32xf32>
    %c1_49 = arith.constant 1 : index
    %c0_50 = arith.constant 0 : index
    %c0_51 = arith.constant 0 : index
    %139 = vector.load %arg4[%c1_49, %c0_50, %c0_51] : memref<2x32x96xf32, #tpu.memory_space<vmem>>, vector<1x32x96xf32>
    %140 = vector.shape_cast %139 : vector<1x32x96xf32> to vector<32x96xf32>
    %cst_52 = arith.constant dense<0.000000e+00> : vector<8x96xf32>
    %141 = tpu.matmul %136, %140, %cst_52 {dimension_numbers = #tpu.dot_dimension_numbers<[1], [0], [0], [1], [0, 0, 1, 1], [], []>} : vector<8x32xf32>, vector<32x96xf32>, vector<8x96xf32> -> vector<8x96xf32>
    %c1_53 = arith.constant 1 : index
    %c0_54 = arith.constant 0 : index
    %c0_55 = arith.constant 0 : index
    %142 = vector.load %arg5[%c1_53, %c0_54, %c0_55] : memref<2x1x96xf32, #tpu.memory_space<vmem>>, vector<1x1x96xf32>
    %143 = vector.shape_cast %142 : vector<1x1x96xf32> to vector<1x96xf32>
    %144 = vector.broadcast %143 : vector<1x96xf32> to vector<8x96xf32>
    %145 = arith.addf %141, %144 : vector<8x96xf32>
    %146 = vector.extract_strided_slice %145 {offsets = [0, 0], sizes = [8, 8], strides = [1, 1]} : vector<8x96xf32> to vector<8x8xf32>
    %147 = vector.extract_strided_slice %145 {offsets = [0, 8], sizes = [8, 8], strides = [1, 1]} : vector<8x96xf32> to vector<8x8xf32>
    %148 = vector.extract_strided_slice %145 {offsets = [0, 16], sizes = [8, 8], strides = [1, 1]} : vector<8x96xf32> to vector<8x8xf32>
    %149 = vector.extract_strided_slice %145 {offsets = [0, 24], sizes = [8, 8], strides = [1, 1]} : vector<8x96xf32> to vector<8x8xf32>
    %150 = vector.shape_cast %146 : vector<8x8xf32> to vector<1x8x8xf32>
    %151 = vector.shape_cast %147 : vector<8x8xf32> to vector<1x8x8xf32>
    %152 = vector.shape_cast %148 : vector<8x8xf32> to vector<1x8x8xf32>
    %153 = vector.shape_cast %149 : vector<8x8xf32> to vector<1x8x8xf32>
    %154 = tpu.concatenate %150, %151, %152, %153 in 0 : vector<1x8x8xf32>, vector<1x8x8xf32>, vector<1x8x8xf32>, vector<1x8x8xf32> -> vector<4x8x8xf32>
    %155 = vector.extract_strided_slice %145 {offsets = [0, 32], sizes = [8, 8], strides = [1, 1]} : vector<8x96xf32> to vector<8x8xf32>
    %156 = vector.extract_strided_slice %145 {offsets = [0, 40], sizes = [8, 8], strides = [1, 1]} : vector<8x96xf32> to vector<8x8xf32>
    %157 = vector.extract_strided_slice %145 {offsets = [0, 48], sizes = [8, 8], strides = [1, 1]} : vector<8x96xf32> to vector<8x8xf32>
    %158 = vector.extract_strided_slice %145 {offsets = [0, 56], sizes = [8, 8], strides = [1, 1]} : vector<8x96xf32> to vector<8x8xf32>
    %159 = vector.shape_cast %155 : vector<8x8xf32> to vector<1x8x8xf32>
    %160 = vector.shape_cast %156 : vector<8x8xf32> to vector<1x8x8xf32>
    %161 = vector.shape_cast %157 : vector<8x8xf32> to vector<1x8x8xf32>
    %162 = vector.shape_cast %158 : vector<8x8xf32> to vector<1x8x8xf32>
    %163 = tpu.concatenate %159, %160, %161, %162 in 0 : vector<1x8x8xf32>, vector<1x8x8xf32>, vector<1x8x8xf32>, vector<1x8x8xf32> -> vector<4x8x8xf32>
    %164 = vector.extract_strided_slice %145 {offsets = [0, 64], sizes = [8, 8], strides = [1, 1]} : vector<8x96xf32> to vector<8x8xf32>
    %165 = vector.extract_strided_slice %145 {offsets = [0, 72], sizes = [8, 8], strides = [1, 1]} : vector<8x96xf32> to vector<8x8xf32>
    %166 = vector.extract_strided_slice %145 {offsets = [0, 80], sizes = [8, 8], strides = [1, 1]} : vector<8x96xf32> to vector<8x8xf32>
    %167 = vector.extract_strided_slice %145 {offsets = [0, 88], sizes = [8, 8], strides = [1, 1]} : vector<8x96xf32> to vector<8x8xf32>
    %168 = vector.shape_cast %164 : vector<8x8xf32> to vector<1x8x8xf32>
    %169 = vector.shape_cast %165 : vector<8x8xf32> to vector<1x8x8xf32>
    %170 = vector.shape_cast %166 : vector<8x8xf32> to vector<1x8x8xf32>
    %171 = vector.shape_cast %167 : vector<8x8xf32> to vector<1x8x8xf32>
    %172 = tpu.concatenate %168, %169, %170, %171 in 0 : vector<1x8x8xf32>, vector<1x8x8xf32>, vector<1x8x8xf32>, vector<1x8x8xf32> -> vector<4x8x8xf32>
    "tpu.trace_start"() <{level = 10 : i32, message = "hqd,hkd->hqk"}> : () -> ()
    %cst_56 = arith.constant dense<0.000000e+00> : vector<4x8x8xf32>
    %173 = tpu.matmul %154, %163, %cst_56 {dimension_numbers = #tpu.dot_dimension_numbers<[2], [2], [1], [1], [0, 0, 0, 1, 1, 1], [0], [0]>} : vector<4x8x8xf32>, vector<4x8x8xf32>, vector<4x8x8xf32> -> vector<4x8x8xf32>
    "tpu.trace_stop"() : () -> ()
    %cst_57 = arith.constant 0.353553385 : f32
    %174 = vector.broadcast %cst_57 : f32 to vector<4x8x8xf32>
    %175 = arith.mulf %173, %174 : vector<4x8x8xf32>
    %cst_58 = arith.constant dense<0xFF800000> : vector<4x8xf32>
    %176 = vector.multi_reduction <maximumf>, %175, %cst_58 [2] : vector<4x8x8xf32> to vector<4x8xf32>
    %177 = vector.shape_cast %176 : vector<4x8xf32> to vector<4x8x1xf32>
    %178 = vector.broadcast %177 : vector<4x8x1xf32> to vector<4x8x8xf32>
    %179 = arith.subf %175, %178 : vector<4x8x8xf32>
    %180 = math.exp %179 : vector<4x8x8xf32>
    %cst_59 = arith.constant dense<0.000000e+00> : vector<4x8xf32>
    %181 = vector.multi_reduction <add>, %180, %cst_59 [2] : vector<4x8x8xf32> to vector<4x8xf32>
    %182 = vector.shape_cast %181 : vector<4x8xf32> to vector<4x8x1xf32>
    %183 = tpu.reciprocal %182 {approx = true} : vector<4x8x1xf32> -> vector<4x8x1xf32>
    %184 = vector.broadcast %183 : vector<4x8x1xf32> to vector<4x8x8xf32>
    %185 = arith.mulf %180, %184 : vector<4x8x8xf32>
    "tpu.trace_start"() <{level = 10 : i32, message = "hqk,hkd->hqd"}> : () -> ()
    %cst_60 = arith.constant dense<0.000000e+00> : vector<4x8x8xf32>
    %186 = tpu.matmul %185, %172, %cst_60 {dimension_numbers = #tpu.dot_dimension_numbers<[2], [1], [1], [2], [0, 0, 0, 1, 1, 2], [0], [0]>} : vector<4x8x8xf32>, vector<4x8x8xf32>, vector<4x8x8xf32> -> vector<4x8x8xf32>
    "tpu.trace_stop"() : () -> ()
    %187 = vector.extract_strided_slice %186 {offsets = [0, 0, 0], sizes = [1, 8, 8], strides = [1, 1, 1]} : vector<4x8x8xf32> to vector<1x8x8xf32>
    %188 = vector.shape_cast %187 : vector<1x8x8xf32> to vector<8x8xf32>
    %189 = vector.extract_strided_slice %186 {offsets = [1, 0, 0], sizes = [1, 8, 8], strides = [1, 1, 1]} : vector<4x8x8xf32> to vector<1x8x8xf32>
    %190 = vector.shape_cast %189 : vector<1x8x8xf32> to vector<8x8xf32>
    %191 = vector.extract_strided_slice %186 {offsets = [2, 0, 0], sizes = [1, 8, 8], strides = [1, 1, 1]} : vector<4x8x8xf32> to vector<1x8x8xf32>
    %192 = vector.shape_cast %191 : vector<1x8x8xf32> to vector<8x8xf32>
    %193 = vector.extract_strided_slice %186 {offsets = [3, 0, 0], sizes = [1, 8, 8], strides = [1, 1, 1]} : vector<4x8x8xf32> to vector<1x8x8xf32>
    %194 = vector.shape_cast %193 : vector<1x8x8xf32> to vector<8x8xf32>
    %195 = tpu.concatenate %188, %190, %192, %194 in 1 : vector<8x8xf32>, vector<8x8xf32>, vector<8x8xf32>, vector<8x8xf32> -> vector<8x32xf32>
    %c1_61 = arith.constant 1 : index
    %c0_62 = arith.constant 0 : index
    %c0_63 = arith.constant 0 : index
    %196 = vector.load %arg6[%c1_61, %c0_62, %c0_63] : memref<2x32x32xf32, #tpu.memory_space<vmem>>, vector<1x32x32xf32>
    %197 = vector.shape_cast %196 : vector<1x32x32xf32> to vector<32x32xf32>
    %cst_64 = arith.constant dense<0.000000e+00> : vector<8x32xf32>
    %198 = tpu.matmul %195, %197, %cst_64 {dimension_numbers = #tpu.dot_dimension_numbers<[1], [0], [0], [1], [0, 0, 1, 1], [], []>} : vector<8x32xf32>, vector<32x32xf32>, vector<8x32xf32> -> vector<8x32xf32>
    %199 = vector.extract_strided_slice %138 {offsets = [0, 0], sizes = [1, 32], strides = [1, 1]} : vector<6x32xf32> to vector<1x32xf32>
    %200 = vector.broadcast %199 : vector<1x32xf32> to vector<8x32xf32>
    %201 = arith.addf %198, %200 : vector<8x32xf32>
    %202 = arith.addf %136, %201 : vector<8x32xf32>
    %203 = vector.extract_strided_slice %138 {offsets = [1, 0], sizes = [1, 32], strides = [1, 1]} : vector<6x32xf32> to vector<1x32xf32>
    %204 = vector.extract_strided_slice %138 {offsets = [2, 0], sizes = [1, 32], strides = [1, 1]} : vector<6x32xf32> to vector<1x32xf32>
    %cst_65 = arith.constant dense<0.000000e+00> : vector<8xf32>
    %205 = vector.multi_reduction <add>, %202, %cst_65 [1] : vector<8x32xf32> to vector<8xf32>
    %206 = vector.shape_cast %205 : vector<8xf32> to vector<8x1xf32>
    %cst_66 = arith.constant 3.200000e+01 : f32
    %207 = vector.broadcast %cst_66 : f32 to vector<8x1xf32>
    %208 = arith.divf %206, %207 : vector<8x1xf32>
    %209 = vector.broadcast %208 : vector<8x1xf32> to vector<8x32xf32>
    %210 = arith.subf %202, %209 : vector<8x32xf32>
    %211 = arith.mulf %210, %210 : vector<8x32xf32>
    %cst_67 = arith.constant dense<0.000000e+00> : vector<8xf32>
    %212 = vector.multi_reduction <add>, %211, %cst_67 [1] : vector<8x32xf32> to vector<8xf32>
    %213 = vector.shape_cast %212 : vector<8xf32> to vector<8x1xf32>
    %cst_68 = arith.constant 3.200000e+01 : f32
    %214 = vector.broadcast %cst_68 : f32 to vector<8x1xf32>
    %215 = arith.divf %213, %214 : vector<8x1xf32>
    %216 = vector.broadcast %208 : vector<8x1xf32> to vector<8x32xf32>
    %217 = arith.subf %202, %216 : vector<8x32xf32>
    %cst_69 = arith.constant 9.99999974E-6 : f32
    %218 = vector.broadcast %cst_69 : f32 to vector<8x1xf32>
    %219 = arith.addf %215, %218 : vector<8x1xf32>
    %220 = math.rsqrt %219 : vector<8x1xf32>
    %221 = vector.broadcast %220 : vector<8x1xf32> to vector<8x32xf32>
    %222 = arith.mulf %217, %221 : vector<8x32xf32>
    %223 = vector.broadcast %203 : vector<1x32xf32> to vector<8x32xf32>
    %224 = arith.mulf %222, %223 : vector<8x32xf32>
    %225 = vector.broadcast %204 : vector<1x32xf32> to vector<8x32xf32>
    %226 = arith.addf %224, %225 : vector<8x32xf32>
    %c1_70 = arith.constant 1 : index
    %c0_71 = arith.constant 0 : index
    %c0_72 = arith.constant 0 : index
    %227 = vector.load %arg7[%c1_70, %c0_71, %c0_72] : memref<2x32x128xf32, #tpu.memory_space<vmem>>, vector<1x32x128xf32>
    %228 = vector.shape_cast %227 : vector<1x32x128xf32> to vector<32x128xf32>
    %cst_73 = arith.constant dense<0.000000e+00> : vector<8x128xf32>
    %229 = tpu.matmul %226, %228, %cst_73 {dimension_numbers = #tpu.dot_dimension_numbers<[1], [0], [0], [1], [0, 0, 1, 1], [], []>} : vector<8x32xf32>, vector<32x128xf32>, vector<8x128xf32> -> vector<8x128xf32>
    %c1_74 = arith.constant 1 : index
    %c0_75 = arith.constant 0 : index
    %c0_76 = arith.constant 0 : index
    %230 = vector.load %arg8[%c1_74, %c0_75, %c0_76] : memref<2x1x128xf32, #tpu.memory_space<vmem>>, vector<1x1x128xf32>
    %231 = vector.shape_cast %230 : vector<1x1x128xf32> to vector<1x128xf32>
    %232 = vector.broadcast %231 : vector<1x128xf32> to vector<8x128xf32>
    %233 = arith.addf %229, %232 : vector<8x128xf32>
    %cst_77 = arith.constant 0.000000e+00 : f32
    %234 = vector.broadcast %cst_77 : f32 to vector<8x128xf32>
    %235 = arith.maximumf %233, %234 : vector<8x128xf32>
    %c1_78 = arith.constant 1 : index
    %c0_79 = arith.constant 0 : index
    %c0_80 = arith.constant 0 : index
    %236 = vector.load %arg9[%c1_78, %c0_79, %c0_80] : memref<2x128x32xf32, #tpu.memory_space<vmem>>, vector<1x128x32xf32>
    %237 = vector.shape_cast %236 : vector<1x128x32xf32> to vector<128x32xf32>
    %cst_81 = arith.constant dense<0.000000e+00> : vector<8x32xf32>
    %238 = tpu.matmul %235, %237, %cst_81 {dimension_numbers = #tpu.dot_dimension_numbers<[1], [0], [0], [1], [0, 0, 1, 1], [], []>} : vector<8x128xf32>, vector<128x32xf32>, vector<8x32xf32> -> vector<8x32xf32>
    %239 = vector.extract_strided_slice %138 {offsets = [3, 0], sizes = [1, 32], strides = [1, 1]} : vector<6x32xf32> to vector<1x32xf32>
    %240 = vector.broadcast %239 : vector<1x32xf32> to vector<8x32xf32>
    %241 = arith.addf %238, %240 : vector<8x32xf32>
    %242 = arith.addf %226, %241 : vector<8x32xf32>
    %243 = vector.extract_strided_slice %138 {offsets = [4, 0], sizes = [1, 32], strides = [1, 1]} : vector<6x32xf32> to vector<1x32xf32>
    %244 = vector.extract_strided_slice %138 {offsets = [5, 0], sizes = [1, 32], strides = [1, 1]} : vector<6x32xf32> to vector<1x32xf32>
    %cst_82 = arith.constant dense<0.000000e+00> : vector<8xf32>
    %245 = vector.multi_reduction <add>, %242, %cst_82 [1] : vector<8x32xf32> to vector<8xf32>
    %246 = vector.shape_cast %245 : vector<8xf32> to vector<8x1xf32>
    %cst_83 = arith.constant 3.200000e+01 : f32
    %247 = vector.broadcast %cst_83 : f32 to vector<8x1xf32>
    %248 = arith.divf %246, %247 : vector<8x1xf32>
    %249 = vector.broadcast %248 : vector<8x1xf32> to vector<8x32xf32>
    %250 = arith.subf %242, %249 : vector<8x32xf32>
    %251 = arith.mulf %250, %250 : vector<8x32xf32>
    %cst_84 = arith.constant dense<0.000000e+00> : vector<8xf32>
    %252 = vector.multi_reduction <add>, %251, %cst_84 [1] : vector<8x32xf32> to vector<8xf32>
    %253 = vector.shape_cast %252 : vector<8xf32> to vector<8x1xf32>
    %cst_85 = arith.constant 3.200000e+01 : f32
    %254 = vector.broadcast %cst_85 : f32 to vector<8x1xf32>
    %255 = arith.divf %253, %254 : vector<8x1xf32>
    %256 = vector.broadcast %248 : vector<8x1xf32> to vector<8x32xf32>
    %257 = arith.subf %242, %256 : vector<8x32xf32>
    %cst_86 = arith.constant 9.99999974E-6 : f32
    %258 = vector.broadcast %cst_86 : f32 to vector<8x1xf32>
    %259 = arith.addf %255, %258 : vector<8x1xf32>
    %260 = math.rsqrt %259 : vector<8x1xf32>
    %261 = vector.broadcast %260 : vector<8x1xf32> to vector<8x32xf32>
    %262 = arith.mulf %257, %261 : vector<8x32xf32>
    %263 = vector.broadcast %243 : vector<1x32xf32> to vector<8x32xf32>
    %264 = arith.mulf %262, %263 : vector<8x32xf32>
    %265 = vector.broadcast %244 : vector<1x32xf32> to vector<8x32xf32>
    %266 = arith.addf %264, %265 : vector<8x32xf32>
    %cst_87 = arith.constant dense<0.000000e+00> : vector<32xf32>
    %267 = vector.multi_reduction <add>, %266, %cst_87 [0] : vector<8x32xf32> to vector<32xf32>
    %268 = vector.shape_cast %267 : vector<32xf32> to vector<1x32xf32>
    %cst_88 = arith.constant 8.000000e+00 : f32
    %269 = vector.broadcast %cst_88 : f32 to vector<1x32xf32>
    %270 = arith.divf %268, %269 : vector<1x32xf32>
    %c0_89 = arith.constant 0 : index
    %c0_90 = arith.constant 0 : index
    %271 = vector.load %arg11[%c0_89, %c0_90] : memref<32x8xf32, #tpu.memory_space<vmem>>, vector<32x8xf32>
    %cst_91 = arith.constant dense<0.000000e+00> : vector<1x8xf32>
    %272 = tpu.matmul %270, %271, %cst_91 {dimension_numbers = #tpu.dot_dimension_numbers<[1], [0], [0], [1], [0, 0, 1, 1], [], []>} : vector<1x32xf32>, vector<32x8xf32>, vector<1x8xf32> -> vector<1x8xf32>
    %c0_92 = arith.constant 0 : index
    %c0_93 = arith.constant 0 : index
    %273 = vector.load %arg12[%c0_92, %c0_93] : memref<1x8xf32, #tpu.memory_space<vmem>>, vector<1x8xf32>
    %274 = arith.addf %272, %273 : vector<1x8xf32>
    %cst_94 = arith.constant dense<0xFF800000> : vector<1xf32>
    %275 = vector.multi_reduction <maximumf>, %274, %cst_94 [1] : vector<1x8xf32> to vector<1xf32>
    %276 = vector.shape_cast %275 : vector<1xf32> to vector<1x1xf32>
    %277 = vector.broadcast %276 : vector<1x1xf32> to vector<1x8xf32>
    %278 = arith.subf %274, %277 : vector<1x8xf32>
    %279 = math.exp %278 : vector<1x8xf32>
    %cst_95 = arith.constant dense<0.000000e+00> : vector<1xf32>
    %280 = vector.multi_reduction <add>, %279, %cst_95 [1] : vector<1x8xf32> to vector<1xf32>
    %281 = vector.shape_cast %280 : vector<1xf32> to vector<1x1xf32>
    %282 = tpu.reciprocal %281 {approx = true} : vector<1x1xf32> -> vector<1x1xf32>
    %283 = vector.broadcast %282 : vector<1x1xf32> to vector<1x8xf32>
    %284 = arith.mulf %279, %283 : vector<1x8xf32>
    %c0_96 = arith.constant 0 : index
    %c0_97 = arith.constant 0 : index
    %c0_98 = arith.constant 0 : index
    %285 = vector.load %arg13[%c0_96, %c0_97, %c0_98] : memref<1x1x8xf32, #tpu.memory_space<vmem>>, vector<1x1x8xf32>
    %286 = vector.shape_cast %285 : vector<1x1x8xf32> to vector<1x8xf32>
    %287 = vector.shape_cast %284 : vector<1x8xf32> to vector<1x1x8xf32>
    tpu.vector_store %arg13[%c0_96, %c0_97, %c0_98], %287 {strides = array<i32>} : memref<1x1x8xf32, #tpu.memory_space<vmem>>, vector<1x1x8xf32>,
    return
  }
  func.func @transform_0(%arg0: i32) -> (i32, i32, i32) {
    %c0_i32 = arith.constant 0 : i32
    %c0_i32_0 = arith.constant 0 : i32
    %c0_i32_1 = arith.constant 0 : i32
    return %arg0, %c0_i32, %c0_i32_0 : i32, i32, i32
  }
  func.func @transform_1(%arg0: i32) -> (i32, i32) {
    %c0_i32 = arith.constant 0 : i32
    %c0_i32_0 = arith.constant 0 : i32
    %c0_i32_1 = arith.constant 0 : i32
    return %c0_i32, %c0_i32_0 : i32, i32
  }
  func.func @transform_2(%arg0: i32) -> (i32, i32) {
    %c0_i32 = arith.constant 0 : i32
    %c0_i32_0 = arith.constant 0 : i32
    %c0_i32_1 = arith.constant 0 : i32
    return %c0_i32, %c0_i32_0 : i32, i32
  }
  func.func @transform_3(%arg0: i32) -> (i32, i32, i32) {
    %c0_i32 = arith.constant 0 : i32
    %c0_i32_0 = arith.constant 0 : i32
    %c0_i32_1 = arith.constant 0 : i32
    %c0_i32_2 = arith.constant 0 : i32
    return %c0_i32, %c0_i32_0, %c0_i32_1 : i32, i32, i32
  }
  func.func @transform_4(%arg0: i32) -> (i32, i32, i32) {
    %c0_i32 = arith.constant 0 : i32
    %c0_i32_0 = arith.constant 0 : i32
    %c0_i32_1 = arith.constant 0 : i32
    %c0_i32_2 = arith.constant 0 : i32
    return %c0_i32, %c0_i32_0, %c0_i32_1 : i32, i32, i32
  }
  func.func @transform_5(%arg0: i32) -> (i32, i32, i32) {
    %c0_i32 = arith.constant 0 : i32
    %c0_i32_0 = arith.constant 0 : i32
    %c0_i32_1 = arith.constant 0 : i32
    %c0_i32_2 = arith.constant 0 : i32
    return %c0_i32, %c0_i32_0, %c0_i32_1 : i32, i32, i32
  }
  func.func @transform_6(%arg0: i32) -> (i32, i32, i32) {
    %c0_i32 = arith.constant 0 : i32
    %c0_i32_0 = arith.constant 0 : i32
    %c0_i32_1 = arith.constant 0 : i32
    %c0_i32_2 = arith.constant 0 : i32
    return %c0_i32, %c0_i32_0, %c0_i32_1 : i32, i32, i32
  }
  func.func @transform_7(%arg0: i32) -> (i32, i32, i32) {
    %c0_i32 = arith.constant 0 : i32
    %c0_i32_0 = arith.constant 0 : i32
    %c0_i32_1 = arith.constant 0 : i32
    %c0_i32_2 = arith.constant 0 : i32
    return %c0_i32, %c0_i32_0, %c0_i32_1 : i32, i32, i32
  }
  func.func @transform_8(%arg0: i32) -> (i32, i32, i32) {
    %c0_i32 = arith.constant 0 : i32
    %c0_i32_0 = arith.constant 0 : i32
    %c0_i32_1 = arith.constant 0 : i32
    %c0_i32_2 = arith.constant 0 : i32
    return %c0_i32, %c0_i32_0, %c0_i32_1 : i32, i32, i32
  }
  func.func @transform_9(%arg0: i32) -> (i32, i32, i32) {
    %c0_i32 = arith.constant 0 : i32
    %c0_i32_0 = arith.constant 0 : i32
    %c0_i32_1 = arith.constant 0 : i32
    %c0_i32_2 = arith.constant 0 : i32
    return %c0_i32, %c0_i32_0, %c0_i32_1 : i32, i32, i32
  }
  func.func @transform_10(%arg0: i32) -> (i32, i32) {
    %c0_i32 = arith.constant 0 : i32
    %c0_i32_0 = arith.constant 0 : i32
    %c0_i32_1 = arith.constant 0 : i32
    return %c0_i32, %c0_i32_0 : i32, i32
  }
  func.func @transform_11(%arg0: i32) -> (i32, i32) {
    %c0_i32 = arith.constant 0 : i32
    %c0_i32_0 = arith.constant 0 : i32
    %c0_i32_1 = arith.constant 0 : i32
    return %c0_i32, %c0_i32_0 : i32, i32
  }
  func.func @transform_12(%arg0: i32) -> (i32, i32, i32) {
    %c0_i32 = arith.constant 0 : i32
    %c0_i32_0 = arith.constant 0 : i32
    %c0_i32_1 = arith.constant 0 : i32
    return %arg0, %c0_i32, %c0_i32_0 : i32, i32, i32
  }
}

</mosaic_0001>

<bundles_post_ra>
// kernel: tpu_custom_call.1
= control target key start
LH: loop header
LB: loop body
LE: loop exit
PB: predicated region body
PF: predicated region fallthrough
CT: control target
= control target key end

     0   :  { %s2265_s0 = inlined_call_operand.vmem [shape: f32[2,8,16], index: 0, kind: input, shape index: {}]   ;;  %s2266_s1 = inlined_call_operand.vmem [shape: f32[16,32], index: 1, kind: input, shape index: {}]   ;;  %s2267_s2 = inlined_call_operand.vmem [shape: f32[1,32], index: 2, kind: input, shape index: {}]   ;;  %s2268_s3 = inlined_call_operand.vmem [shape: f32[2,32,96], index: 3, kind: input, shape index: {}]   ;;  %s2269_s4 = inlined_call_operand.vmem [shape: f32[2,1,96], index: 4, kind: input, shape index: {}]   ;;  %s2270_s5 = inlined_call_operand.vmem [shape: f32[2,32,32], index: 5, kind: input, shape index: {}]   ;;  %s2271_s6 = inlined_call_operand.vmem [shape: f32[2,32,128], index: 6, kind: input, shape index: {}]   ;;  %s2272_s7 = inlined_call_operand.vmem [shape: f32[2,1,128], index: 7, kind: input, shape index: {}]   ;;  %s2273_s8 = inlined_call_operand.vmem [shape: f32[2,128,32], index: 8, kind: input, shape index: {}]   ;;  %s2274_s9 = inlined_call_operand.vmem [shape: f32[2,6,32], index: 9, kind: input, shape index: {}]   ;;  %s2275_s10 = inlined_call_operand.vmem [shape: f32[32,8], index: 10, kind: input, shape index: {}]   ;;  %s2276_s11 = inlined_call_operand.vmem [shape: f32[1,8], index: 11, kind: input, shape index: {}]   ;;  %s2277_s12 = inlined_call_operand.hbm [shape: f32[2,1,8], index: 12, kind: output, shape index: {}]  }
   0x1   :  { %2288 = sst [smem:[#allocation6_spill]] %s2265_s0 }
   0x2   :  { %17 = vsyncpa [#allocation3], 0 }
   0x3   :  { %19 = vsyncpa [#allocation3 + $0x1], 0  ;;  %s1823_s21 = smov 0   ;;  %s1825_s22 = smov 0  }
   0x4   :  { %s1827_s23 = smov 0   ;;  %s1829_s24 = smov 0  }
   0x5 LB: > { %s1844_s25 = sadd.s32 4294967295, %s1746_s24   ;;  %s1502_s26 = sadd.s32 4294967294, %s1746_s24   ;;  %s1746_s24 = sphi %s1829_s24, %s2305_s24   ;;  %s1742_s23 = sphi %s1827_s23, %s2304_s23   ;;  %s1738_s22 = sphi %s1825_s22, %s2303_s22   ;;  %s1734_s21 = sphi %s1823_s21, %s2302_s21  }
   0x6   : > { %s1848_s27 = sadd.s32 1, %s1746_s24   ;;  %s289_s28 = sadd.s32 1, %s1742_s23 }
   0x7   : > { %s286_s29 = ssub.s32 %s1746_s24, %s1848_s27  ;;  %p299_p0 = scmp.ne.s32.totalorder %s1742_s23, %s1738_s22 }
   0x8   : > { %p287_p1 = scmp.eq.s32.totalorder %s286_s29, 0  ;;  %p300_p2 = scmp.eq.s32.totalorder %s1844_s25, 1 }
   0x9   : > { %p305_p3 = scmp.ne.s32.totalorder %s1738_s22, %s1734_s21  ;;  %p306_p4 = scmp.eq.s32.totalorder %s1502_s26, 1 }
   0xa   : > { %s1859_s30 = scalar_select %p287_p1, %s1742_s23, %s289_s28  }
   0xb   : > { %p1861_p5 = por %p300_p2, %p299_p0  ;;  %p1865_p6 = por %p306_p4, %p305_p3 }
   0xc   : > { %2289 = sst [smem:[#allocation5_spill]] %s1859_s30  ;;  %p1505_p7 = scmp.ge.s32.totalorder %s1746_s24, 1 }
   0xd   : > { %p364_p8 = scmp.lt.s32.totalorder %s1746_s24, 3 }
   0xf   : > { %p365_p9 = pnand %p1505_p7, %p364_p8 }
  0x10   : > { %p404_p10 = scmp.lt.s32.totalorder (!%p365_p9), %s1844_s25, 1  ;;  %s2292_s0 = sld [smem:[#allocation6_spill]] (!%p365_p9) }
  0x11   : > { %368 = sbr.rel (%p365_p9) target bundleno = 4431 (0x114f), region = 68  ;;  %s2282_s16 = smov (!%p365_p9), 112  }
  0x12   : > { %s2280_s18 = smov (!%p365_p9), 96   ;;  %s2283_s19 = smov (!%p365_p9), 120  }
  0x13   : > { %s2278_s20 = smov (!%p365_p9), 64   ;;  %s2284_s26 = smov (!%p365_p9), 8  }
  0x14   : > { %s2285_s28 = smov (!%p365_p9), 16   ;;  %s2295_s30 = smov (!%p365_p9), 112  }
  0x16   : > { %v410_v0 = vld [vmem:[%s2266_s1 + $0x8] sm:$0xff]  ;;  %v409_v1 = vld [vmem:[%s2266_s1] sm:$0xff]  ;;  %v443_v2 = vld [vmem:[%s2268_s3 + $0x18] sm:$0xff]  ;;  %s405_s29 = scalar_select %p404_p10, %s1844_s25, 1  ;;  %vm415_vm0 = vcmask 130048   ;;  %vm448_vm1 = vcmask 261120  }
  0x17   : > { %433 = vmatpush.msra.mxu0 %v410_v0  ;;  %464 = vmatpush.msra.mxu2 %v443_v2  ;;  %v442_v3 = vld [vmem:[%s2268_s3 + $0x10] sm:$0xff]  ;;  %v441_v5 = vld [vmem:[%s2268_s3 + $0x8] sm:$0xff]  ;;  %v440_v6 = vld [vmem:[%s2268_s3] sm:$0xff]  ;;  %vm481_vm2 = vcmask 64512   ;;  %vm750_vm3 = vcmask 195584  }
  0x18   : > { %s1506_s15 = sshll.u32 %s405_s29, 3  ;;  %v1631_v7 = vld [vmem:[%s2267_s2] ss:$0 sm:$0xff]  ;;  %s2286_s29 = smov 24  }
  0x19   : > { %434 = vmatpush.msra.mxu0 %v409_v1  ;;  %465 = vmatpush.msra.mxu2 %v442_v3  ;;  %s407_s17 = scalar_lea.vmem %s2292_s0, %s1506_s15  ;;  %v1632_v10 = vld [vmem:[%s2269_s4] ss:$0 sm:$0xff]  ;;  %s2296_s15 = smov 96  }
  0x1a   : > { %v408_v4 = vld [vmem:[%s407_s17] sm:$0xff]  ;;  %s2287_s17 = smov 104  }
  0x1b   : > { %1507 = vmatmul.msk.f32.vlgmr.msra.gmra.mxu0 %vm415_vm0, %v408_v4  ;;  %466 = vmatpush.msra.mxu2 %v441_v5 }
  0x1d   : > { %467 = vmatpush.msra.mxu2 %v440_v6 }
  0x98   : > { %v436_v8 = vpop.f32.mrf.mxu0 }
  0x99   : > { %v1898_v9 = vadd.f32 %v1631_v7, %v436_v8 }
  0x9b   : > { %1508 = vmatmul.msk.f32.vlgmr.msra.gmra.mxu2 %vm448_vm1, %v1898_v9 }
 0x11e   : > { %v469_v11 = vpop.f32.mrf.mxu2 }
 0x11f   : > { %v1905_v12 = vadd.f32 %v1632_v10, %v469_v11  ;;  %v755_v10 = vld [vmem:[%s2270_s5 + $0x18] sm:$0xff]  ;;  %v754_v11 = vld [vmem:[%s2270_s5 + $0x10] sm:$0xff] }
 0x121   : > { %475 = vrot.lane.b32.xlu1 %v1905_v12, %s2282_s16  ;;  %477 = vrot.lane.b32.xlu0 %v1905_v12, %s2287_s17  ;;  %s2297_s17 = smov 64   ;;  %s2299_s16 = smov 8  }
 0x129   : > { %479 = vrot.lane.b32.xlu1 %v1905_v12, %s2280_s18  ;;  %473 = vrot.lane.b32.xlu0 %v1905_v12, %s2283_s19 }
 0x193   : > { %v1915_v13 = vpop.permute.xlu1 %475  ;;  %v478_v14 = vpop.permute.xlu0 %477 }
 0x194   : > { %532 = vrot.lane.b32.xlu0 %v1915_v13, %s2280_s18  ;;  %558 = vrot.lane.b32.xlu2 %v478_v14, %s2280_s18 }
 0x19b   : > { %v480_v15 = vpop.permute.xlu1 %479  ;;  %v474_v16 = vpop.permute.xlu0 %473 }
 0x19c   : > { %1509 = vmatpush.xpose.msk.msrb.mxu2 %vm481_vm2, %v480_v15  ;;  %506 = vrot.lane.b32.xlu2 %v474_v16, %s2280_s18  ;;  %v1621_v51 = vpack.i.bf16 %v474_v16, %v478_v14  ;;  %s2300_s18 = smov 24  }
 0x19f   : > { %1510 = vmatmul.msk.f32.vlgmr.msrb.gmra.mxu2 %vm481_vm2, %v1905_v12 }
 0x1ee   : > { %v559_v17 = vpop.permute.xlu2 %558 }
 0x1ef   : > { %1515 = vmatpush.xpose.msk.msra.mxu2 %vm481_vm2, %v559_v17 }
 0x1f2   : > { %1516 = vmatmul.msk.f32.vlgmr.msra.gmra.mxu2 %vm481_vm2, %v478_v14 }
 0x1f6   : > { %v507_v18 = vpop.permute.xlu2 %506 }
 0x1f7   : > { %1511 = vmatpush.xpose.msk.msra.mxu3 %vm481_vm2, %v507_v18 }
 0x1fa   : > { %1512 = vmatmul.msk.f32.vlgmr.msra.gmra.mxu3 %vm481_vm2, %v474_v16 }
 0x206   : > { %v533_v19 = vpop.permute.xlu0 %532 }
 0x207   : > { %1513 = vmatpush.xpose.msk.msrb.mxu0 %vm481_vm2, %v533_v19 }
 0x20a   : > { %1514 = vmatmul.msk.f32.vlgmr.msrb.gmra.mxu0 %vm481_vm2, %v1915_v13 }
 0x222   : > { %v503_v20 = vpop.f32.mrf.mxu2 }
 0x223   : > { %v584_v27 = vmul.f32 0.35355338, %v503_v20 }
 0x225   : > { %v588_v30 = vsel %vm481_vm2, %v584_v27, -inf }
 0x275   : > { %v581_v21 = vpop.f32.mrf.mxu2 }
 0x276   : > { %v587_v22 = vmul.f32 0.35355338, %v581_v21  ;;  %v1970_v21 = vld [vmem:[%s2274_s9] sm:$0x3f] }
 0x278   : > { %v597_v23 = vsel %vm481_vm2, %v587_v22, -inf }
 0x279   : > { %598 = vmax.xlane.f32.xlu1 %v597_v23 }
 0x27d   : > { %v529_v24 = vpop.f32.mrf.mxu3 }
 0x27e   : > { %v585_v25 = vmul.f32 0.35355338, %v529_v24 }
 0x280   : > { %v591_v26 = vsel %vm481_vm2, %v585_v25, -inf }
 0x281   : > { %592 = vmax.xlane.f32.xlu2 %v591_v26 }
 0x287   : > { %v555_v28 = vpop.f32.mrf.mxu0 }
 0x288   : > { %v586_v29 = vmul.f32 0.35355338, %v555_v28 }
 0x289   : > { %589 = vmax.xlane.f32.xlu2 %v588_v30 }
 0x28a   : > { %v594_v31 = vsel %vm481_vm2, %v586_v29, -inf }
 0x28b   : > { %595 = vmax.xlane.f32.xlu0 %v594_v31 }
 0x2ec   : > { %v599_v32 = vpop.xlane.xlu1 %598 }
 0x2ed   : > { %v603_v33 = vsub.f32 %v587_v22, %v599_v32  ;;  %v756_v22 = vperm.slane %v1970_v21, 0 }
 0x2ef   : > { %v610_v34 = vmul.f32 1.442695, %v603_v33 }
 0x2f1   : > { %1636 = vpow2.f32 %v610_v34 }
 0x2f4   : > { %v593_v35 = vpop.xlane.xlu2 %592 }
 0x2f5   : > { %v601_v36 = vsub.f32 %v585_v25, %v593_v35 }
 0x2f7   : > { %v1637_v37 = vpop.eup %1636  ;;  %v606_v38 = vmul.f32 1.442695, %v601_v36 }
 0x2f8   : > { %v621_v39 = vsel %vm481_vm2, %v1637_v37, 0.0 }
 0x2f9   : > { %1638 = vpow2.f32 %v606_v38  ;;  %622 = vadd.xlane.f32.xlu1 %v621_v39  ;;  %v817_v38 = vld [vmem:[%s2271_s6 + $0x18] sm:$0xff]  ;;  %v816_v39 = vld [vmem:[%s2271_s6 + $0x10] sm:$0xff] }
 0x2fc   : > { %v590_v40 = vpop.xlane.xlu2 %589 }
 0x2fd   : > { %v600_v45 = vsub.f32 %v584_v27, %v590_v40  ;;  %v1756_v27 = vmov 32.0   ;;  %v815_v40 = vld [vmem:[%s2271_s6 + $0x8] sm:$0xff] }
 0x2fe   : > { %v596_v41 = vpop.xlane.xlu0 %595 }
 0x2ff   : > { %v1639_v42 = vpop.eup %1638  ;;  %v602_v43 = vsub.f32 %v586_v29, %v596_v41  ;;  %v604_v47 = vmul.f32 1.442695, %v600_v45  ;;  %v814_v41 = vld [vmem:[%s2271_s6] sm:$0xff] }
 0x300   : > { %v615_v44 = vsel %vm481_vm2, %v1639_v42, 0.0 }
 0x301   : > { %v608_v46 = vmul.f32 1.442695, %v602_v43  ;;  %616 = vadd.xlane.f32.xlu2 %v615_v44  ;;  %v860_v43 = vld [vmem:[%s2273_s8 + $0x70] sm:$0xff]  ;;  %v859_v44 = vld [vmem:[%s2273_s8 + $0x68] sm:$0xff] }
 0x303   : > { %1640 = vpow2.f32 %v608_v46 }
 0x304   : > { %1642 = vpow2.f32 %v604_v47  ;;  %v858_v47 = vld [vmem:[%s2273_s8 + $0x60] sm:$0xff] }
 0x309   : > { %v1641_v48 = vpop.eup %1640 }
 0x30a   : > { %v618_v49 = vsel %vm481_vm2, %v1641_v48, 0.0  ;;  %v1643_v50 = vpop.eup %1642 }
 0x30b   : > { %619 = vadd.xlane.f32.xlu0 %v618_v49  ;;  %v612_v52 = vsel %vm481_vm2, %v1643_v50, 0.0  ;;  %v857_v49 = vld [vmem:[%s2273_s8 + $0x58] sm:$0xff] }
 0x312   : > { %1622 = vrot.lane.b32.xlu1 %v1621_v51, %s2278_s20  ;;  %v855_v51 = vld [vmem:[%s2273_s8 + $0x48] sm:$0xff] }
 0x313   : > { %613 = vadd.xlane.f32.xlu0 %v612_v52  ;;  %v854_v52 = vld [vmem:[%s2273_s8 + $0x40] sm:$0xff] }
 0x319   : > { %684 = vrot.lane.b32.xlu2 %v1915_v13, %s2278_s20  ;;  %v752_v13 = vld [vmem:[%s2270_s5] sm:$0xff] }
 0x327   : > { %632 = vrot.lane.b32.xlu0 %v1905_v12, %s2278_s20  ;;  %v753_v12 = vld [vmem:[%s2270_s5 + $0x8] sm:$0xff] }
 0x36c   : > { %v623_v54 = vpop.xlane.xlu1 %622 }
 0x374   : > { %v617_v53 = vpop.xlane.xlu2 %616 }
 0x375   : > { %1644 = vrcp.f32 %v617_v53 }
 0x376   : > { %1646 = vrcp.f32 %v623_v54  ;;  %v853_v54 = vld [vmem:[%s2273_s8 + $0x38] sm:$0xff] }
 0x37b   : > { %v1645_v57 = vpop.eup %1644 }
 0x37c   : > { %v685_v55 = vpop.permute.xlu2 %684  ;;  %v1647_v58 = vpop.eup %1646  ;;  %v629_v0 = vmul.f32 %v1645_v57, %v1639_v42  ;;  %v861_v42 = vld [vmem:[%s2273_s8 + $0x78] sm:$0xff] }
 0x37d   : > { %705 = vmatpush.msra.mxu0 %v685_v55  ;;  %v631_v1 = vmul.f32 %v1647_v58, %v1637_v37  ;;  %v851_v58 = vld [vmem:[%s2273_s8 + $0x28] sm:$0xff] }
 0x37e   : > { %v620_v56 = vpop.xlane.xlu0 %619 }
 0x37f   : > { %1648 = vrcp.f32 %v620_v56  ;;  %863 = vmatpush.msrb.mxu0 %v861_v42  ;;  %v852_v56 = vld [vmem:[%s2273_s8 + $0x30] sm:$0xff] }
 0x381   : > { %864 = vmatpush.msrb.mxu0 %v860_v43 }
 0x383   : > { %865 = vmatpush.msrb.mxu0 %v859_v44  ;;  %v1634_v44 = vld [vmem:[%s2269_s4 + $0x1] ss:$0 sm:$0xff] }
 0x384   : > { %v1623_v59 = vpop.permute.xlu1 %1622 }
 0x385   : > { %v1649_v60 = vpop.eup %1648  ;;  %v1624_v61 = vunpack.i.l.bf16 %v1623_v59  ;;  %v1625_v62 = vunpack.i.h.bf16 %v1623_v59  ;;  %866 = vmatpush.msrb.mxu0 %v858_v47 }
 0x386   : > { %v630_v63 = vmul.f32 %v1649_v60, %v1641_v48  ;;  %v614_v2 = vpop.xlane.xlu0 %613  ;;  %v850_v60 = vld [vmem:[%s2273_s8 + $0x20] sm:$0xff] }
 0x387   : > { %679 = vmatpush.msra.mxu1 %v1625_v62  ;;  %731 = vmatpush.msrb.mxu2 %v1624_v61  ;;  %1650 = vrcp.f32 %v614_v2  ;;  %v849_v62 = vld [vmem:[%s2273_s8 + $0x18] sm:$0xff] }
 0x388   : > { %1518 = vmatmul.msk.f32.vlgmr.msra.gmra.mxu1 %vm481_vm2, %v629_v0  ;;  %1519 = vmatmul.msk.f32.vlgmr.msra.gmra.mxu0 %vm481_vm2, %v630_v63  ;;  %1652 = vrcp.f32 %v1756_v27  ;;  %v810_v0 = vperm.slane %v1970_v21, 1  ;;  %v1525_v27 = vld [vmem:[%s2268_s3 + $0x28] sm:$0xff] }
 0x389   : > { %1520 = vmatmul.msk.f32.vlgmr.msrb.gmra.mxu2 %vm481_vm2, %v631_v1  ;;  %867 = vmatpush.msrb.mxu0 %v857_v49 }
 0x38d   : > { %v1651_v3 = vpop.eup %1650 }
 0x38e   : > { %v628_v5 = vmul.f32 %v1651_v3, %v1643_v50  ;;  %v1653_v28 = vpop.eup %1652  ;;  %v856_v50 = vld [vmem:[%s2273_s8 + $0x50] sm:$0xff]  ;;  %v812_v3 = vperm.slane %v1970_v21, 2 }
 0x38f   : > { %v785_v29 = vmul.f32 32.0, %v1653_v28  ;;  %vm789_vm4 = vweird.f32 %v1653_v28  ;;  %868 = vmatpush.msrb.mxu0 %v856_v50 }
 0x391   : > { %v786_v30 = vsub.f32 1.0, %v785_v29  ;;  %869 = vmatpush.msrb.mxu0 %v855_v51 }
 0x393   : > { %v787_v31 = vmul.f32 %v1653_v28, %v786_v30  ;;  %870 = vmatpush.msrb.mxu0 %v854_v52 }
 0x395   : > { %v788_v32 = vadd.f32 %v1653_v28, %v787_v31  ;;  %871 = vmatpush.msrb.mxu0 %v853_v54 }
 0x397   : > { %v1975_v33 = vsel %vm789_vm4, %v1653_v28, %v788_v32  ;;  %872 = vmatpush.msrb.mxu0 %v852_v56  ;;  %v1524_v28 = vld [vmem:[%s2268_s3 + $0x20] sm:$0xff] }
 0x399   : > { %v633_v4 = vpop.permute.xlu0 %632  ;;  %873 = vmatpush.msrb.mxu0 %v851_v58 }
 0x39a   : > { %653 = vmatpush.msrb.mxu3 %v633_v4 }
 0x39b   : > { %1517 = vmatmul.msk.f32.vlgmr.msrb.gmra.mxu3 %vm481_vm2, %v628_v5  ;;  %874 = vmatpush.msrb.mxu0 %v850_v60 }
 0x39c   : > { %772 = vmatpush.msra.mxu3 %v755_v10  ;;  %v1633_v10 = vld [vmem:[%s2272_s7] ss:$0 sm:$0xff] }
 0x39d   : > { %875 = vmatpush.msrb.mxu0 %v849_v62 }
 0x39e   : > { %773 = vmatpush.msra.mxu3 %v754_v11 }
 0x3a0   : > { %774 = vmatpush.msra.mxu3 %v753_v12 }
 0x3a2   : > { %775 = vmatpush.msra.mxu3 %v752_v13 }
 0x3a4   : > { %837 = vmatpush.msrb.mxu3 %v817_v38  ;;  %v906_v38 = vperm.slane %v1970_v21, 4 }
 0x3a6   : > { %838 = vmatpush.msrb.mxu3 %v816_v39 }
 0x3a8   : > { %839 = vmatpush.msrb.mxu3 %v815_v40 }
 0x3aa   : > { %840 = vmatpush.msrb.mxu3 %v814_v41  ;;  %v908_v41 = vperm.slane %v1970_v21, 5 }
 0x405   : > { %v681_v6 = vpop.f32.mrf.mxu1  ;;  %v707_v7 = vpop.f32.mrf.mxu0 }
 0x406   : > { %737 = vrot.lane.b32.xlu1 %v681_v6, %s2284_s26  ;;  %741 = vrot.lane.b32.xlu2 %v707_v7, %s2285_s28  ;;  %v848_v6 = vld [vmem:[%s2273_s8 + $0x10] sm:$0xff]  ;;  %v847_v7 = vld [vmem:[%s2273_s8 + $0x8] sm:$0xff]  ;;  %s2293_s26 = smov 104   ;;  %s2294_s28 = smov 120  }
 0x407   : > { %876 = vmatpush.msrb.mxu0 %v848_v6 }
 0x409   : > { %877 = vmatpush.msrb.mxu0 %v847_v7 }
 0x40c   : > { %v733_v8 = vpop.f32.mrf.mxu2 }
 0x40e   : > { %745 = vrot.lane.b32.xlu1 %v733_v8, %s2286_s29  ;;  %v846_v8 = vld [vmem:[%s2273_s8] sm:$0xff]  ;;  %s2298_s29 = smov 16  }
 0x40f   : > { %878 = vmatpush.msrb.mxu0 %v846_v8 }
 0x41e   : > { %v655_v15 = vpop.f32.mrf.mxu3 }
 0x460   : > { %v742_v17 = vpop.permute.xlu2 %741 }
 0x478   : > { %v738_v14 = vpop.permute.xlu1 %737 }
 0x479   : > { %v748_v16 = vsel %vm481_vm2, %v655_v15, %v738_v14  ;;  %v862_v14 = vperm.slane %v1970_v21, 3 }
 0x47a   : > { %v749_v19 = vsel %vm415_vm0, %v748_v16, %v742_v17 }
 0x480   : > { %v746_v18 = vpop.permute.xlu1 %745 }
 0x481   : > { %v751_v20 = vsel %vm750_vm3, %v749_v19, %v746_v18 }
 0x482   : > { %1521 = vmatmul.msk.f32.vlgmr.msra.gmra.mxu3 %vm448_vm1, %v751_v20 }
 0x505   : > { %v777_v23 = vpop.f32.mrf.mxu3 }
 0x506   : > { %v778_v24 = vadd.f32 %v777_v23, %v756_v22 }
 0x508   : > { %v780_v25 = vadd.f32 %v778_v24, %v1898_v9 }
 0x50a   : > { %v781_v26 = vsel %vm448_vm1, %v780_v25, 0.0 }
 0x50b   : > { %782 = vadd.xlane.f32.xlu0 %v781_v26  ;;  %v1526_v26 = vld [vmem:[%s2268_s3 + $0x30] sm:$0xff] }
 0x57e   : > { %v783_v34 = vpop.xlane.xlu0 %782 }
 0x57f   : > { %v791_v35 = vmul.f32 %v1975_v33, %v783_v34 }
 0x581   : > { %v792_v36 = vsub.f32 %v780_v25, %v791_v35  ;;  %v1527_v25 = vld [vmem:[%s2268_s3 + $0x38] sm:$0xff] }
 0x582   : > { %937 = vmatpush.msra.mxu2 %v1527_v25 }
 0x583   : > { %v793_v37 = vmul.f32 %v792_v36, %v792_v36 }
 0x584   : > { %938 = vmatpush.msra.mxu2 %v1526_v26 }
 0x585   : > { %v794_v9 = vsel %vm448_vm1, %v793_v37, 0.0 }
 0x586   : > { %795 = vadd.xlane.f32.xlu2 %v794_v9  ;;  %939 = vmatpush.msra.mxu2 %v1525_v27 }
 0x588   : > { %940 = vmatpush.msra.mxu2 %v1524_v28 }
 0x5f9   : > { %v796_v45 = vpop.xlane.xlu2 %795 }
 0x5fa   : > { %v797_v46 = vmul.f32 %v796_v45, %v1975_v33 }
 0x5fc   : > { %v798_v48 = vadd.f32 1e-05, %v797_v46 }
 0x5fe   : > { %1654 = vrsqrt.f32 %v798_v48  ;;  %vm805_vm6 = vweird.f32 %v798_v48 }
 0x604   : > { %v1655_v53 = vpop.eup %1654 }
 0x605   : > { %v800_v55 = vmul.f32 %v1655_v53, %v798_v48  ;;  %vm806_vm5 = vweird.f32 %v1655_v53 }
 0x606   : > { %vm807_vm7 = vmor %vm805_vm6, %vm806_vm5 }
 0x607   : > { %v801_v57 = vmul.f32 %v1655_v53, %v800_v55 }
 0x609   : > { %v802_v59 = vmul.f32 0.5, %v801_v57 }
 0x60b   : > { %v803_v61 = vsub.f32 1.5, %v802_v59 }
 0x60d   : > { %v804_v63 = vmul.f32 %v1655_v53, %v803_v61 }
 0x60f   : > { %v808_v1 = vsel %vm807_vm7, %v1655_v53, %v804_v63 }
 0x610   : > { %v809_v2 = vmul.f32 %v808_v1, %v792_v36 }
 0x612   : > { %v811_v4 = vmul.f32 %v810_v0, %v809_v2 }
 0x614   : > { %v813_v5 = vadd.f32 %v812_v3, %v811_v4 }
 0x616   : > { %1522 = vmatmul.msk.f32.vlgmr.msrb.gmra.mxu3 %vm448_vm1, %v813_v5 }
 0x699   : > { %v842_v11 = vpop.f32.mrf.mxu3 }
 0x69a   : > { %v843_v12 = vadd.f32 %v1633_v10, %v842_v11 }
 0x69c   : > { %v845_v13 = vmax.f32 %v843_v12, 0.0 }
 0x69e   : > { %879 = vmatmul.f32.vlgmr.msrb.gmra.mxu0 %v845_v13 }
 0x71b   : > { %v880_v15 = vpop.f32.mrf.mxu0 }
 0x71c   : > { %v881_v16 = vadd.f32 %v880_v15, %v862_v14 }
 0x71e   : > { %v883_v17 = vadd.f32 %v881_v16, %v813_v5 }
 0x720   : > { %v884_v18 = vsel %vm448_vm1, %v883_v17, 0.0 }
 0x721   : > { %885 = vadd.xlane.f32.xlu1 %v884_v18 }
 0x794   : > { %v886_v19 = vpop.xlane.xlu1 %885 }
 0x795   : > { %v887_v20 = vmul.f32 %v886_v19, %v1975_v33 }
 0x797   : > { %v888_v22 = vsub.f32 %v883_v17, %v887_v20 }
 0x799   : > { %v889_v23 = vmul.f32 %v888_v22, %v888_v22 }
 0x79b   : > { %v890_v24 = vsel %vm448_vm1, %v889_v23, 0.0 }
 0x79c   : > { %891 = vadd.xlane.f32.xlu0 %v890_v24 }
 0x80f   : > { %v892_v29 = vpop.xlane.xlu0 %891 }
 0x810   : > { %v893_v30 = vmul.f32 %v892_v29, %v1975_v33 }
 0x812   : > { %v894_v31 = vadd.f32 1e-05, %v893_v30 }
 0x814   : > { %1656 = vrsqrt.f32 %v894_v31  ;;  %vm901_vm9 = vweird.f32 %v894_v31 }
 0x81a   : > { %v1657_v32 = vpop.eup %1656 }
 0x81b   : > { %v896_v34 = vmul.f32 %v1657_v32, %v894_v31  ;;  %vm902_vm8 = vweird.f32 %v1657_v32 }
 0x81c   : > { %vm903_vm10 = vmor %vm901_vm9, %vm902_vm8 }
 0x81d   : > { %v897_v35 = vmul.f32 %v1657_v32, %v896_v34 }
 0x81f   : > { %v898_v36 = vmul.f32 0.5, %v897_v35 }
 0x821   : > { %v899_v37 = vsub.f32 1.5, %v898_v36 }
 0x823   : > { %v900_v9 = vmul.f32 %v1657_v32, %v899_v37 }
 0x825   : > { %v904_v39 = vsel %vm903_vm10, %v1657_v32, %v900_v9 }
 0x826   : > { %v905_v40 = vmul.f32 %v904_v39, %v888_v22 }
 0x828   : > { %v907_v42 = vmul.f32 %v906_v38, %v905_v40 }
 0x82a   : > { %v2065_v43 = vadd.f32 %v908_v41, %v907_v42 }
 0x82c   : > { %1529 = vmatmul.msk.f32.vlgmr.msra.gmra.mxu2 %vm448_vm1, %v2065_v43 }
 0x8af   : > { %v942_v45 = vpop.f32.mrf.mxu2 }
 0x8b0   : > { %v2072_v46 = vadd.f32 %v1634_v44, %v942_v45 }
 0x8b2   : > { %950 = vrot.lane.b32.xlu0 %v2072_v46, %s2293_s26  ;;  %946 = vrot.lane.b32.xlu1 %v2072_v46, %s2294_s28  ;;  %s402_s26 = sand.u32 1, %s1738_s22  }
 0x8b3   : > { %948 = vrot.lane.b32.xlu2 %v2072_v46, %s2295_s30 }
 0x8bb   : > { %952 = vrot.lane.b32.xlu2 %v2072_v46, %s2296_s15 }
 0x90d   : > { %v949_v21 = vpop.permute.xlu2 %948 }
 0x90e   : > { %1004 = vrot.lane.b32.xlu0 %v949_v21, %s2296_s15 }
 0x915   : > { %v953_v47 = vpop.permute.xlu2 %952 }
 0x916   : > { %1530 = vmatpush.xpose.msk.msra.mxu3 %vm481_vm2, %v953_v47  ;;  %v1543_v47 = vld [vmem:[%s2270_s5 + $0x28] sm:$0xff] }
 0x919   : > { %1531 = vmatmul.msk.f32.vlgmr.msra.gmra.mxu3 %vm481_vm2, %v2072_v46 }
 0x924   : > { %v951_v48 = vpop.permute.xlu0 %950  ;;  %v947_v49 = vpop.permute.xlu1 %946 }
 0x925   : > { %978 = vrot.lane.b32.xlu1 %v947_v49, %s2296_s15  ;;  %1030 = vrot.lane.b32.xlu2 %v951_v48, %s2296_s15  ;;  %v1626_v23 = vpack.i.bf16 %v947_v49, %v2072_v46  ;;  %v1545_v46 = vld [vmem:[%s2270_s5 + $0x38] sm:$0xff]  ;;  %s1443_s15 = scalar_lea.hbm %s2277_s12, %s1844_s25  ;;  %s1704_s25 = scalar_lea.hbm %s2277_s12, 2 }
 0x97f   : > { %v1031_v50 = vpop.permute.xlu2 %1030 }
 0x980   : > { %v1005_v51 = vpop.permute.xlu0 %1004  ;;  %1536 = vmatpush.xpose.msk.msrb.mxu3 %vm481_vm2, %v1031_v50 }
 0x981   : > { %1534 = vmatpush.xpose.msk.msrb.mxu2 %vm481_vm2, %v1005_v51 }
 0x983   : > { %1537 = vmatmul.msk.f32.vlgmr.msrb.gmra.mxu3 %vm481_vm2, %v951_v48 }
 0x984   : > { %1535 = vmatmul.msk.f32.vlgmr.msrb.gmra.mxu2 %vm481_vm2, %v949_v21 }
 0x997   : > { %v979_v52 = vpop.permute.xlu1 %978 }
 0x998   : > { %1532 = vmatpush.xpose.msk.msrb.mxu1 %vm481_vm2, %v979_v52 }
 0x99b   : > { %1533 = vmatmul.msk.f32.vlgmr.msrb.gmra.mxu1 %vm481_vm2, %v947_v49 }
 0x99c   : > { %v975_v53 = vpop.f32.mrf.mxu3 }
 0x99d   : > { %v1056_v54 = vmul.f32 0.35355338, %v975_v53 }
 0x99f   : > { %v1060_v55 = vsel %vm481_vm2, %v1056_v54, -inf }
 0x9a0   : > { %1061 = vmax.xlane.f32.xlu0 %v1060_v55  ;;  %v2132_v55 = vld [vmem:[%s2274_s9 + $0x8] sm:$0x3f] }
 0xa06   : > { %v1053_v56 = vpop.f32.mrf.mxu3 }
 0xa07   : > { %v1027_v57 = vpop.f32.mrf.mxu2  ;;  %v1059_v58 = vmul.f32 0.35355338, %v1053_v56  ;;  %v1228_v56 = vperm.slane %v2132_v55, 0 }
 0xa08   : > { %v1058_v59 = vmul.f32 0.35355338, %v1027_v57 }
 0xa09   : > { %v1069_v60 = vsel %vm481_vm2, %v1059_v58, -inf }
 0xa0a   : > { %v1066_v61 = vsel %vm481_vm2, %v1058_v59, -inf  ;;  %1070 = vmax.xlane.f32.xlu0 %v1069_v60 }
 0xa0b   : > { %1067 = vmax.xlane.f32.xlu2 %v1066_v61 }
 0xa13   : > { %v1062_v62 = vpop.xlane.xlu0 %1061 }
 0xa14   : > { %v1072_v63 = vsub.f32 %v1056_v54, %v1062_v62 }
 0xa16   : > { %v1076_v0 = vmul.f32 1.442695, %v1072_v63 }
 0xa18   : > { %v1001_v1 = vpop.f32.mrf.mxu1  ;;  %1658 = vpow2.f32 %v1076_v0 }
 0xa19   : > { %v1057_v2 = vmul.f32 0.35355338, %v1001_v1 }
 0xa1b   : > { %v1063_v3 = vsel %vm481_vm2, %v1057_v2, -inf }
 0xa1c   : > { %1064 = vmax.xlane.f32.xlu1 %v1063_v3  ;;  %v1548_v3 = vld [vmem:[%s2271_s6 + $0x28] sm:$0xff] }
 0xa1e   : > { %v1659_v4 = vpop.eup %1658 }
 0xa1f   : > { %v1084_v5 = vsel %vm481_vm2, %v1659_v4, 0.0 }
 0xa24   : > { %1085 = vadd.xlane.f32.xlu1 %v1084_v5  ;;  %v1568_v5 = vld [vmem:[%s2273_s8 + $0xf8] sm:$0xff] }
 0xa7d   : > { %v1071_v6 = vpop.xlane.xlu0 %1070 }
 0xa7e   : > { %v1075_v7 = vsub.f32 %v1059_v58, %v1071_v6  ;;  %v1068_v8 = vpop.xlane.xlu2 %1067  ;;  %v1567_v6 = vld [vmem:[%s2273_s8 + $0xf0] sm:$0xff] }
 0xa7f   : > { %v1074_v10 = vsub.f32 %v1058_v59, %v1068_v8 }
 0xa80   : > { %v1082_v11 = vmul.f32 1.442695, %v1075_v7  ;;  %v1566_v7 = vld [vmem:[%s2273_s8 + $0xe8] sm:$0xff] }
 0xa81   : > { %v1080_v12 = vmul.f32 1.442695, %v1074_v10 }
 0xa82   : > { %1660 = vpow2.f32 %v1082_v11  ;;  %v1565_v11 = vld [vmem:[%s2273_s8 + $0xe0] sm:$0xff] }
 0xa83   : > { %1662 = vpow2.f32 %v1080_v12 }
 0xa88   : > { %v1661_v13 = vpop.eup %1660 }
 0xa89   : > { %v1663_v14 = vpop.eup %1662  ;;  %v1093_v15 = vsel %vm481_vm2, %v1661_v13, 0.0 }
 0xa8a   : > { %1094 = vadd.xlane.f32.xlu1 %v1093_v15  ;;  %v1090_v16 = vsel %vm481_vm2, %v1663_v14, 0.0  ;;  %v1562_v15 = vld [vmem:[%s2273_s8 + $0xc8] sm:$0xff] }
 0xa8b   : > { %1091 = vadd.xlane.f32.xlu0 %v1090_v16  ;;  %v1561_v16 = vld [vmem:[%s2273_s8 + $0xc0] sm:$0xff] }
 0xa8f   : > { %v1065_v17 = vpop.xlane.xlu1 %1064 }
 0xa90   : > { %v1073_v18 = vsub.f32 %v1057_v2, %v1065_v17  ;;  %v1550_v2 = vld [vmem:[%s2271_s6 + $0x38] sm:$0xff] }
 0xa92   : > { %v1078_v19 = vmul.f32 1.442695, %v1073_v18  ;;  %v1560_v18 = vld [vmem:[%s2273_s8 + $0xb8] sm:$0xff] }
 0xa94   : > { %1664 = vpow2.f32 %v1078_v19 }
 0xa97   : > { %v1086_v25 = vpop.xlane.xlu1 %1085 }
 0xa9a   : > { %v1665_v20 = vpop.eup %1664 }
 0xa9b   : > { %v1087_v22 = vsel %vm481_vm2, %v1665_v20, 0.0 }
 0xa9c   : > { %1088 = vadd.xlane.f32.xlu2 %v1087_v22 }
 0xa9f   : > { %1156 = vrot.lane.b32.xlu0 %v949_v21, %s2297_s17  ;;  %v1544_v21 = vld [vmem:[%s2270_s5 + $0x30] sm:$0xff] }
 0xaa3   : > { %1182 = vrot.lane.b32.xlu1 %v951_v48, %s2297_s17  ;;  %v1542_v48 = vld [vmem:[%s2270_s5 + $0x20] sm:$0xff] }
 0xab4   : > { %1627 = vrot.lane.b32.xlu2 %v1626_v23, %s2297_s17  ;;  %v1558_v23 = vld [vmem:[%s2273_s8 + $0xa8] sm:$0xff]  ;;  %s403_s17 = scalar_lea.vmem [#allocation2], %s402_s26 }
 0xafd   : > { %v1095_v30 = vpop.xlane.xlu1 %1094 }
 0xafe   : > { %v1092_v24 = vpop.xlane.xlu0 %1091 }
 0xaff   : > { %1666 = vrcp.f32 %v1092_v24 }
 0xb00   : > { %1668 = vrcp.f32 %v1086_v25  ;;  %v1557_v25 = vld [vmem:[%s2273_s8 + $0xa0] sm:$0xff] }
 0xb05   : > { %v1667_v26 = vpop.eup %1666 }
 0xb06   : > { %v1102_v28 = vmul.f32 %v1667_v26, %v1663_v14  ;;  %v1669_v31 = vpop.eup %1668  ;;  %v1563_v14 = vld [vmem:[%s2273_s8 + $0xd0] sm:$0xff] }
 0xb07   : > { %v1100_v37 = vmul.f32 %v1669_v31, %v1659_v4  ;;  %v1547_v4 = vld [vmem:[%s2271_s6 + $0x20] sm:$0xff] }
 0xb0f   : > { %v1089_v27 = vpop.xlane.xlu2 %1088 }
 0xb10   : > { %1670 = vrcp.f32 %v1089_v27  ;;  %v1556_v27 = vld [vmem:[%s2273_s8 + $0x98] sm:$0xff] }
 0xb11   : > { %v1157_v29 = vpop.permute.xlu0 %1156  ;;  %1672 = vrcp.f32 %v1095_v30 }
 0xb12   : > { %1177 = vmatpush.msra.mxu3 %v1157_v29  ;;  %v1275_v29 = vperm.slane %v2132_v55, 1 }
 0xb13   : > { %1540 = vmatmul.msk.f32.vlgmr.msra.gmra.mxu3 %vm481_vm2, %v1102_v28 }
 0xb14   : > { %1304 = vmatpush.msrb.mxu3 %v1550_v2 }
 0xb15   : > { %v1183_v38 = vpop.permute.xlu1 %1182 }
 0xb16   : > { %v1671_v32 = vpop.eup %1670 }
 0xb17   : > { %v1628_v34 = vpop.permute.xlu2 %1627  ;;  %v1101_v9 = vmul.f32 %v1671_v32, %v1665_v20  ;;  %v1673_v39 = vpop.eup %1672  ;;  %v1559_v20 = vld [vmem:[%s2273_s8 + $0xb0] sm:$0xff]  ;;  %v1277_v32 = vperm.slane %v2132_v55, 2 }
 0xb18   : > { %v1630_v35 = vunpack.i.h.bf16 %v1628_v34  ;;  %v1629_v36 = vunpack.i.l.bf16 %v1628_v34  ;;  %v1103_v40 = vmul.f32 %v1673_v39, %v1661_v13  ;;  %v1564_v13 = vld [vmem:[%s2273_s8 + $0xd8] sm:$0xff] }
 0xb1a   : > { %1125 = vmatpush.msra.mxu1 %v1629_v36  ;;  %1151 = vmatpush.msra.mxu2 %v1630_v35  ;;  %v1555_v36 = vld [vmem:[%s2273_s8 + $0x90] sm:$0xff] }
 0xb1b   : > { %1538 = vmatmul.msk.f32.vlgmr.msra.gmra.mxu1 %vm481_vm2, %v1100_v37  ;;  %1539 = vmatmul.msk.f32.vlgmr.msra.gmra.mxu2 %vm481_vm2, %v1101_v9  ;;  %v1554_v37 = vld [vmem:[%s2273_s8 + $0x88] sm:$0xff]  ;;  %v1553_v9 = vld [vmem:[%s2273_s8 + $0x80] sm:$0xff] }
 0xb1c   : > { %1203 = vmatpush.msrb.mxu1 %v1183_v38  ;;  %1244 = vmatpush.msrb.mxu2 %v1545_v46  ;;  %v1635_v38 = vld [vmem:[%s2272_s7 + $0x1] ss:$0 sm:$0xff] }
 0xb1e   : > { %1245 = vmatpush.msrb.mxu2 %v1544_v21  ;;  %1331 = vmatpush.msra.mxu1 %v1568_v5 }
 0xb20   : > { %1246 = vmatpush.msrb.mxu2 %v1543_v47  ;;  %1332 = vmatpush.msra.mxu1 %v1567_v6 }
 0xb22   : > { %1247 = vmatpush.msrb.mxu2 %v1542_v48  ;;  %1333 = vmatpush.msra.mxu1 %v1566_v7 }
 0xb23   : > { %1541 = vmatmul.msk.f32.vlgmr.msrb.gmra.mxu1 %vm481_vm2, %v1103_v40 }
 0xb24   : > { %1334 = vmatpush.msra.mxu1 %v1565_v11 }
 0xb26   : > { %1335 = vmatpush.msra.mxu1 %v1564_v13 }
 0xb28   : > { %1336 = vmatpush.msra.mxu1 %v1563_v14 }
 0xb2a   : > { %1337 = vmatpush.msra.mxu1 %v1562_v15 }
 0xb2c   : > { %1338 = vmatpush.msra.mxu1 %v1561_v16 }
 0xb2e   : > { %1339 = vmatpush.msra.mxu1 %v1560_v18 }
 0xb30   : > { %1340 = vmatpush.msra.mxu1 %v1559_v20 }
 0xb32   : > { %1341 = vmatpush.msra.mxu1 %v1558_v23 }
 0xb34   : > { %1342 = vmatpush.msra.mxu1 %v1557_v25 }
 0xb36   : > { %1343 = vmatpush.msra.mxu1 %v1556_v27 }
 0xb38   : > { %1344 = vmatpush.msra.mxu1 %v1555_v36 }
 0xb3a   : > { %1345 = vmatpush.msra.mxu1 %v1554_v37 }
 0xb3c   : > { %1346 = vmatpush.msra.mxu1 %v1553_v9 }
 0xb96   : > { %v1179_v41 = vpop.f32.mrf.mxu3 }
 0xb97   : > { %1213 = vrot.lane.b32.xlu2 %v1179_v41, %s2298_s29  ;;  %s1445_s29 = sshll.u32 %s403_s17, 4  ;;  %s1446_s29 = int_to_ptr.vmem [resolvable:$true] %s1445_s29 }
 0xb98   : > { %v1127_v42 = vpop.f32.mrf.mxu1 }
 0xb9e   : > { %v1153_v44 = vpop.f32.mrf.mxu2 }
 0xb9f   : > { %1209 = vrot.lane.b32.xlu0 %v1153_v44, %s2299_s16  ;;  %s1447_s16 = sshll.u32 %s1443_s15, 4  ;;  %s1448_s16 = int_to_ptr.hbm [resolvable:$true] %s1447_s16 }
 0xba0   : > { %v1205_v45 = vpop.f32.mrf.mxu1  ;;  %s1698_s19 = sshra.s32 %s1448_s16, 4  ;;  %s1699_s19 = int_to_ptr.hbm [resolvable:$true] %s1698_s19 }
 0xba1   : > { %1217 = vrot.lane.b32.xlu1 %v1205_v45, %s2300_s18  ;;  %s1435_s18 = scalar_lea.sflag [#allocation3], %s402_s26  ;;  %s1700_s20 = scalar_lea.hbm %s1699_s19, 1 }
 0xba2   : > { %p1701_p11 = scmp.ne.s32.totalorder %s1699_s19, %s1700_s20  ;;  %p1705_p0 = scmp.lt.s32.totalorder %s1699_s19, %s2277_s12 }
 0xba3   : > { %p1706_p1 = scmp.lt.s32.totalorder %s1704_s25, %s1700_s20 }
 0xba4   : > { %p1702_p12 = pnand %p1701_p11, %p1861_p5 }
 0xba5   : > { %p1707_p2 = por %p1706_p1, %p1705_p0 }
 0xba6   : > { %p1703_p13 = pneg %p1702_p12 }
 0xba8   : > { %p1708_p3 = pnand %p1707_p2, %p1703_p13 }
 0xbf1   : > { %v1214_v50 = vpop.permute.xlu2 %1213 }
 0xc11   : > { %v1210_v49 = vpop.permute.xlu0 %1209 }
 0xc12   : > { %v1220_v51 = vsel %vm481_vm2, %v1127_v42, %v1210_v49  ;;  %v1330_v42 = vperm.slane %v2132_v55, 3 }
 0xc13   : > { %v1221_v52 = vsel %vm415_vm0, %v1220_v51, %v1214_v50  ;;  %v1218_v53 = vpop.permute.xlu1 %1217 }
 0xc14   : > { %v1222_v54 = vsel %vm750_vm3, %v1221_v52, %v1218_v53  ;;  %v1396_v53 = vld [vmem:[%s2275_s10 + $0x18] sm:$0xff]  ;;  %vm1421_vm3 = vcmask 57344  }
 0xc15   : > { %1546 = vmatmul.msk.f32.vlgmr.msrb.gmra.mxu2 %vm448_vm1, %v1222_v54  ;;  %v1395_v54 = vld [vmem:[%s2275_s10 + $0x10] sm:$0xff]  ;;  %1413 = vmatpush.msra.mxu0 %v1396_v53 }
 0xc17   : > { %1414 = vmatpush.msra.mxu0 %v1395_v54 }
 0xc98   : > { %v1249_v57 = vpop.f32.mrf.mxu2 }
 0xc99   : > { %v1250_v58 = vadd.f32 %v1249_v57, %v1228_v56  ;;  %v1394_v57 = vld [vmem:[%s2275_s10 + $0x8] sm:$0xff] }
 0xc9a   : > { %1415 = vmatpush.msra.mxu0 %v1394_v57 }
 0xc9b   : > { %v1252_v59 = vadd.f32 %v1250_v58, %v2065_v43  ;;  %v1549_v43 = vld [vmem:[%s2271_s6 + $0x30] sm:$0xff] }
 0xc9c   : > { %1305 = vmatpush.msrb.mxu3 %v1549_v43  ;;  %v1374_v43 = vperm.slane %v2132_v55, 4 }
 0xc9d   : > { %v1253_v60 = vsel %vm448_vm1, %v1252_v59, 0.0 }
 0xc9e   : > { %1254 = vadd.xlane.f32.xlu0 %v1253_v60  ;;  %1306 = vmatpush.msrb.mxu3 %v1548_v3 }
 0xca0   : > { %1307 = vmatpush.msrb.mxu3 %v1547_v4  ;;  %v1376_v4 = vperm.slane %v2132_v55, 5  ;;  %v1397_v55 = vld [vmem:[%s2276_s11] sm:$0x1] }
 0xd11   : > { %v1255_v61 = vpop.xlane.xlu0 %1254 }
 0xd12   : > { %v1256_v62 = vmul.f32 %v1255_v61, %v1975_v33 }
 0xd14   : > { %v1257_v63 = vsub.f32 %v1252_v59, %v1256_v62  ;;  %v1393_v59 = vld [vmem:[%s2275_s10] sm:$0xff] }
 0xd15   : > { %1416 = vmatpush.msra.mxu0 %v1393_v59 }
 0xd16   : > { %v1258_v0 = vmul.f32 %v1257_v63, %v1257_v63 }
 0xd18   : > { %v1259_v1 = vsel %vm448_vm1, %v1258_v0, 0.0 }
 0xd19   : > { %1260 = vadd.xlane.f32.xlu2 %v1259_v1 }
 0xd8c   : > { %v1261_v8 = vpop.xlane.xlu2 %1260 }
 0xd8d   : > { %v1262_v10 = vmul.f32 %v1261_v8, %v1975_v33 }
 0xd8f   : > { %v1263_v12 = vadd.f32 1e-05, %v1262_v10 }
 0xd91   : > { %1674 = vrsqrt.f32 %v1263_v12  ;;  %vm1270_vm12 = vweird.f32 %v1263_v12 }
 0xd97   : > { %v1675_v17 = vpop.eup %1674 }
 0xd98   : > { %v1265_v19 = vmul.f32 %v1675_v17, %v1263_v12  ;;  %vm1271_vm11 = vweird.f32 %v1675_v17 }
 0xd99   : > { %vm1272_vm13 = vmor %vm1270_vm12, %vm1271_vm11 }
 0xd9a   : > { %v1266_v22 = vmul.f32 %v1675_v17, %v1265_v19 }
 0xd9c   : > { %v1267_v24 = vmul.f32 0.5, %v1266_v22 }
 0xd9e   : > { %v1268_v26 = vsub.f32 1.5, %v1267_v24 }
 0xda0   : > { %v1269_v28 = vmul.f32 %v1675_v17, %v1268_v26 }
 0xda2   : > { %v1273_v30 = vsel %vm1272_vm13, %v1675_v17, %v1269_v28 }
 0xda3   : > { %v1274_v31 = vmul.f32 %v1273_v30, %v1257_v63  ;;  %v1757_v63 = vmov 8.0  }
 0xda5   : > { %v1276_v34 = vmul.f32 %v1275_v29, %v1274_v31 }
 0xda7   : > { %v1278_v35 = vadd.f32 %v1277_v32, %v1276_v34 }
 0xda9   : > { %1552 = vmatmul.msk.f32.vlgmr.msrb.gmra.mxu3 %vm448_vm1, %v1278_v35 }
 0xe2c   : > { %v1309_v39 = vpop.f32.mrf.mxu3 }
 0xe2d   : > { %v1310_v40 = vadd.f32 %v1635_v38, %v1309_v39 }
 0xe2f   : > { %v1312_v41 = vmax.f32 %v1310_v40, 0.0 }
 0xe31   : > { %1347 = vmatmul.f32.vlgmr.msra.gmra.mxu1 %v1312_v41 }
 0xeae   : > { %v1348_v44 = vpop.f32.mrf.mxu1 }
 0xeaf   : > { %v1349_v45 = vadd.f32 %v1348_v44, %v1330_v42 }
 0xeb1   : > { %v1351_v46 = vadd.f32 %v1349_v45, %v1278_v35 }
 0xeb3   : > { %v1352_v21 = vsel %vm448_vm1, %v1351_v46, 0.0 }
 0xeb4   : > { %1353 = vadd.xlane.f32.xlu1 %v1352_v21 }
 0xf27   : > { %v1354_v47 = vpop.xlane.xlu1 %1353 }
 0xf28   : > { %v1355_v48 = vmul.f32 %v1354_v47, %v1975_v33 }
 0xf2a   : > { %v1356_v49 = vsub.f32 %v1351_v46, %v1355_v48 }
 0xf2c   : > { %v1357_v50 = vmul.f32 %v1356_v49, %v1356_v49 }
 0xf2e   : > { %v1358_v51 = vsel %vm448_vm1, %v1357_v50, 0.0 }
 0xf2f   : > { %1359 = vadd.xlane.f32.xlu0 %v1358_v51 }
 0xfa2   : > { %v1360_v52 = vpop.xlane.xlu0 %1359 }
 0xfa3   : > { %v1361_v56 = vmul.f32 %v1360_v52, %v1975_v33 }
 0xfa5   : > { %v1362_v58 = vadd.f32 1e-05, %v1361_v56 }
 0xfa7   : > { %1676 = vrsqrt.f32 %v1362_v58  ;;  %vm1369_vm15 = vweird.f32 %v1362_v58 }
 0xfa8   : > { %1678 = vrcp.f32 %v1757_v63 }
 0xfad   : > { %v1677_v60 = vpop.eup %1676 }
 0xfae   : > { %v1364_v61 = vmul.f32 %v1677_v60, %v1362_v58  ;;  %vm1370_vm14 = vweird.f32 %v1677_v60  ;;  %v1679_v1 = vpop.eup %1678 }
 0xfaf   : > { %vm1371_vm0 = vmor %vm1369_vm15, %vm1370_vm14  ;;  %v1386_v6 = vmul.f32 8.0, %v1679_v1  ;;  %vm1390_vm2 = vweird.f32 %v1679_v1 }
 0xfb0   : > { %v1365_v62 = vmul.f32 %v1677_v60, %v1364_v61 }
 0xfb1   : > { %v1387_v10 = vsub.f32 1.0, %v1386_v6 }
 0xfb2   : > { %v1366_v33 = vmul.f32 0.5, %v1365_v62 }
 0xfb3   : > { %v1388_v13 = vmul.f32 %v1679_v1, %v1387_v10 }
 0xfb4   : > { %v1367_v0 = vsub.f32 1.5, %v1366_v33 }
 0xfb5   : > { %v1389_v16 = vadd.f32 %v1679_v1, %v1388_v13 }
 0xfb6   : > { %v1368_v2 = vmul.f32 %v1677_v60, %v1367_v0 }
 0xfb7   : > { %v1391_v19 = vsel %vm1390_vm2, %v1679_v1, %v1389_v16 }
 0xfb8   : > { %v1372_v3 = vsel %vm1371_vm0, %v1677_v60, %v1368_v2 }
 0xfb9   : > { %v1373_v5 = vmul.f32 %v1372_v3, %v1356_v49 }
 0xfbb   : > { %v1375_v7 = vmul.f32 %v1374_v43, %v1373_v5 }
 0xfbd   : > { %v1377_v8 = vadd.f32 %v1376_v4, %v1375_v7 }
 0xfbf   : > { %v1378_v11 = vsel %vm448_vm1, %v1377_v8, 0.0 }
 0xfc0   : > { %v1379_v12 = vrot.slane %v1378_v11, 4 }
 0xfc2   : > { %v1380_v14 = vadd.f32 %v1379_v12, %v1378_v11 }
 0xfc4   : > { %v1381_v15 = vrot.slane %v1380_v14, 2 }
 0xfc6   : > { %v1382_v17 = vadd.f32 %v1381_v15, %v1380_v14 }
 0xfc8   : > { %v1383_v18 = vrot.slane %v1382_v17, 1 }
 0xfca   : > { %v1384_v20 = vadd.f32 %v1383_v18, %v1382_v17 }
 0xfcc   : > { %v1392_v22 = vmul.f32 %v1391_v19, %v1384_v20 }
 0xfce   : > { %1569 = vmatmul.msk.f32.vlgmr.msra.gmra.mxu0 %vm448_vm1, %v1392_v22 }
0x104b   : > { %v1418_v23 = vpop.f32.mrf.mxu0 }
0x104c   : > { %v1419_v24 = vadd.f32 %v1418_v23, %v1397_v55 }
0x104e   : > { %v1422_v25 = vsel %vm1421_vm3, %v1419_v24, -inf }
0x104f   : > { %1423 = vmax.xlane.f32.xlu2 %v1422_v25 }
0x10c2   : > { %v1424_v26 = vpop.xlane.xlu2 %1423 }
0x10c3   : > { %v1425_v27 = vsub.f32 %v1419_v24, %v1424_v26 }
0x10c5   : > { %v1426_v28 = vmul.f32 1.442695, %v1425_v27 }
0x10c7   : > { %1680 = vpow2.f32 %v1426_v28 }
0x10cd   : > { %v1681_v29 = vpop.eup %1680 }
0x10ce   : > { %v1428_v30 = vsel %vm1421_vm3, %v1681_v29, 0.0 }
0x10cf   : > { %1429 = vadd.xlane.f32.xlu1 %v1428_v30 }
0x1142   : > { %v1430_v31 = vpop.xlane.xlu1 %1429 }
0x1143   : > { %1682 = vrcp.f32 %v1430_v31 }
0x1149   : > { %v1683_v32 = vpop.eup %1682 }
0x114a   : > { %v1432_v34 = vmul.f32 %v1683_v32, %v1681_v29 }
0x114c   : > { %1433 = vst.msk [vmem:[%s403_s17] sm:$0x1] %vm1421_vm3, %v1432_v34 }
0x114d   : > { %1711 = shalt.err (!%p1708_p3)
}
0x114e   : > { %1572 = dma.vmem_to_hbm [thread:$0]  (%p1861_p5), %s1446_s29, 16, %s1448_s16, %s1435_s18  }
0x114f PF: > { %p1578_p4 = scmp.ge.s32.totalorder %s1746_s24, 2  ;;  %s1459_s26 = sand.u32 1, %s1734_s21  }
0x1150   : > { %s1460_s0 = scalar_lea.sflag [#allocation3], %s1459_s26 }
0x1151   : > { %p1575_p7 = pnand %p1578_p4, %p1865_p6 }
0x1153   : > { %p1576_p8 = pneg %p1575_p7 }
0x1155   : > { %1729 = dma.done.wait (%p1576_p8), %s1460_s0, 16  }
0x1156   : > { %1731 = vsyncadd (%p1576_p8), %s1460_s0, 4294967280  ;;  %s2301_s17 = sld [smem:[#allocation5_spill]]  ;;  %p22_p9 = scmp.ge.s32.totalorder %s1848_s27, 4  }
0x1157   : > { %s2302_s21 = smov %s1738_s22  ;;  %s2303_s22 = smov %s1742_s23 }
0x1158   : > { %s2305_s24 = smov %s1848_s27  ;;  %24 = sbr.rel (!%p22_p9) target bundleno = 5 (0x5), region = 110 }
0x115c   : > { %s2304_s23 = smov %s2301_s17 }
0x115d   :  { %1465 = vsyncpa [#allocation3], 1 }
0x115e   :  { %1467 = vsyncpa [#allocation3 + $0x1], 1 }

</bundles_post_ra>
